<compile_context>
chip_gen: v6e
topology: v6e:2x2x1
jax: 0.10.0
libtpu: 0.0.40
codegen_flags: <defaults>
</compile_context>

<pallas_src>
import jax
import jax.numpy as jnp
import numpy as np
from jax.experimental import pallas as pl
from jax.experimental.pallas import tpu as pltpu

EPS = 1e-5


def _full_spec(shape):
    return pl.BlockSpec(shape, lambda: (0,) * len(shape))


# ------------------------------- fused forward ------------------------------

def voice_embed_net(params, x):
    """params from init_params; x: (N, input_channel, L) f32.

    Returns (N, output_channel, 1, 1) f32 (matches the PyTorch module).
    """
    n, c_in0, l0 = x.shape
    conv_params = params[:-1]                 # 4 x (w_fused, gamma, beta)
    w_last, bias_last = params[-1]            # (3*c_in, c_out) bf16, (1, c_out) f32

    # Static per-layer geometry.
    c_dims = [c_in0] + [p[0].shape[1] for p in params]   # [c_in0, ch..., c_out]
    c_out_final = c_dims[-1]
    l_ins, l_outs = [], []
    l = l0
    for _ in range(5):
        # torch Conv1d(k=3,s=2,p=1) gives (l+1)//2 for odd l; this fused kernel
        # (like the previous one) assumes every intermediate length is even.
        assert l % 2 == 0, "sequence length must be divisible by 32"
        l_ins.append(l)
        l //= 2
        l_outs.append(l)
    m_ins = [n * li for li in l_ins]
    m_outs = [n * lo for lo in l_outs]

    # Hoisted constants: 0 at the first output position of each sequence
    # (where the conv's left zero-pad sits), 1 elsewhere.  Built once from
    # static shapes -> baked as constants, no per-layer iota/compare in-kernel.
    masks = []
    for i in range(5):
        mk = np.where(np.arange(m_outs[i]) % l_outs[i] == 0, 0.0, 1.0)
        masks.append(jnp.asarray(mk, jnp.float32).reshape(m_outs[i], 1))

    # One-time layout change to channels-last, flattened (N*L, C).  Negligible
    # at this size; at scale keep activations channels-last at the producer.
    h0 = jnp.transpose(x, (0, 2, 1)).reshape(n * l0, c_in0).astype(jnp.float32)

    n_layer_refs = 4 * 4 + 3          # [w,gamma,beta,mask]x4 + [w,bias,mask]
    o_idx = 1 + n_layer_refs

    def kernel(*refs):
        x_ref = refs[0]
        o_ref = refs[o_idx]
        scr = refs[o_idx + 1:]
        act = scr[0:5]        # padded activations (m_in+1, c_in)   f32
        tap = scr[5:10]       # fused tap matrices (m_out, 3*c_in)  f32
        pool_scr = scr[10]    # last conv output   (n*l_last, c_out) f32

        # Stage the input with one leading zero row (the conv's left pad).
        act[0][0:1, :] = jnp.zeros((1, c_dims[0]), jnp.float32)
        act[0][1:1 + n * l_ins[0], :] = x_ref[...]

        for i in range(5):
            c_in, c_out = c_dims[i], c_dims[i + 1]
            l_out = l_outs[i]
            m_out = n * l_out
            base = 1 + 4 * i
            is_last = i == 4

            w_ref = refs[base]
            mask_ref = refs[base + 2] if is_last else refs[base + 3]

            # ---- conv taps via strided sublane reads (linear in L) ---------
            # padded row 2r   = input pos 2t-1  (left tap; zero / masked)
            # padded row 2r+1 = input pos 2t    (center tap)
            # padded row 2r+2 = input pos 2t+1  (right tap)
            hbuf = act[i]
            left = hbuf[pl.ds(0, m_out, stride=2), :] * mask_ref[...]
            center = hbuf[pl.ds(1, m_out, stride=2), :]
            right = hbuf[pl.ds(2, m_out, stride=2), :]

            # ---- pack taps -> single bf16 MXU matmul per layer --------------
            tbuf = tap[i]
            tbuf[:, 0:c_in] = left
            tbuf[:, c_in:2 * c_in] = center
            tbuf[:, 2 * c_in:3 * c_in] = right
            y = jnp.dot(tbuf[...].astype(jnp.bfloat16), w_ref[...],
                        preferred_element_type=jnp.float32)      # f32 accumulate

            if not is_last:
                g_ref, b_ref = refs[base + 1], refs[base + 2]
                # One-pass BN stats (sum & sum-of-squares, f32), folded with
                # ReLU into a single scale/shift FMA; rsqrt on the EUP.
                inv_m = 1.0 / m_out
                s1 = jnp.sum(y, axis=0, keepdims=True)
                s2 = jnp.sum(y * y, axis=0, keepdims=True)
                mean = s1 * inv_m
                var = s2 * inv_m - mean * mean
                scale = g_ref[...] * jax.lax.rsqrt(var + EPS)
                shift = b_ref[...] - mean * scale
                h = jnp.maximum(y * scale + shift, 0.0)
                # Stage next layer's padded activation buffer.
                nxt = act[i + 1]
                nxt[0:1, :] = jnp.zeros((1, c_out), jnp.float32)
                nxt[1:1 + m_out, :] = h
            else:
                # Final conv: bias + global average pool, no pool matrix --
                # l_out strided row reads (one row per batch each) + adds.
                bias_ref = refs[base + 1]
                pool_scr[...] = y
                acc = pool_scr[pl.ds(0, n, stride=l_out), :]
                for j in range(1, l_out):
                    acc = acc + pool_scr[pl.ds(j, n, stride=l_out), :]
                o_ref[...] = acc * (1.0 / l_out) + bias_ref[...]

    flat_inputs = [h0]
    in_specs = [_full_spec(h0.shape)]
    for i in range(4):
        w_f, gamma, beta = conv_params[i]
        flat_inputs += [w_f, gamma, beta, masks[i]]
        in_specs += [_full_spec(w_f.shape), _full_spec(gamma.shape),
                     _full_spec(beta.shape), _full_spec(masks[i].shape)]
    flat_inputs += [w_last, bias_last, masks[4]]
    in_specs += [_full_spec(w_last.shape), _full_spec(bias_last.shape),
                 _full_spec(masks[4].shape)]

    scratch_shapes = tuple(
        [pltpu.VMEM((m_ins[i] + 1, c_dims[i]), jnp.float32) for i in range(5)]
        + [pltpu.VMEM((m_outs[i], 3 * c_dims[i]), jnp.float32) for i in range(5)]
        + [pltpu.VMEM((m_outs[4], c_dims[5]), jnp.float32)]
    )

    # Gridless single call is right at this demo size; at realistic N*L add a
    # (N, L)-tiled grid with two-pass BN (required on v7x: 64 MiB VMEM, 2 TCs)
    # and a lane-dense out_spec.  The (2, 8) output is too small to matter.
    out = pl.pallas_call(
        kernel,
        out_shape=jax.ShapeDtypeStruct((n, c_out_final), jnp.float32),
        in_specs=in_specs,
        out_specs=_full_spec((n, c_out_final)),
        scratch_shapes=scratch_shapes,
    )(*flat_inputs)

    # matches x.view(N, -1, 1, 1)
    return out.reshape(n, c_out_final, 1, 1)


# --------------------------------- params -----------------------------------

def init_params(key, input_channel, channels, output_channel):
    """Returns (kernel_params, raw_torch_layout_params).

    Kernel params are pre-transformed once: conv weights fused to
    (3*c_in, c_out) rows ordered [k=0 | k=1 | k=2] and pre-cast to bf16 for
    native-rate MXU matmuls (f32 accumulation in-kernel); gamma/beta/bias as
    (1, C) f32.  No per-forward relayout glue.
    """
    dims = [input_channel] + list(channels) + [output_channel]
    kparams, raw = [], []
    for i in range(5):
        c_in, c_out = dims[i], dims[i + 1]
        key, kw, kg, kb = jax.random.split(key, 4)
        w = 0.1 * jax.random.normal(kw, (c_out, c_in, 3), jnp.float32)  # torch layout
        w_fused = (jnp.transpose(w, (2, 1, 0))          # (3, c_in, c_out)
                   .reshape(3 * c_in, c_out)
                   .astype(jnp.bfloat16))
        if i < 4:
            gamma = 1.0 + 0.1 * jax.random.normal(kg, (c_out,), jnp.float32)
            beta = 0.1 * jax.random.normal(kb, (c_out,), jnp.float32)
            kparams.append((w_fused, gamma.reshape(1, c_out), beta.reshape(1, c_out)))
            raw.append((w, gamma, beta))
        else:
            bias = 0.1 * jax.random.normal(kb, (c_out,), jnp.float32)
            kparams.append((w_fused, bias.reshape(1, c_out)))
            raw.append((w, bias))
    return kparams, raw


# ----------------------------- pure-JAX reference ----------------------------

def _ref_conv1d(x, w, emulate_bf16):
    """Conv1d(k=3, s=2, p=1); x: (N, C_in, L), w: (C_out, C_in, 3)."""
    n, c_in, l = x.shape
    l_out = l // 2
    if emulate_bf16:   # emulate MXU bf16-input / f32-accumulate numerics
        x = x.astype(jnp.bfloat16).astype(jnp.float32)
        w = w.astype(jnp.bfloat16).astype(jnp.float32)
    xp = jnp.pad(x, ((0, 0), (0, 0), (1, 1)))
    y = 0.0
    for k in range(3):
        tap = jax.lax.slice(xp, (0, 0, k), (n, c_in, k + 2 * l_out - 1), (1, 1, 2))
        y = y + jnp.einsum('ncl,oc->nol', tap, w[:, :, k],
                           precision=jax.lax.Precision.HIGHEST)
    return y


def reference_forward(raw_params, x, emulate_bf16=False):
    h = x
    for w, gamma, beta in raw_params[:4]:
        y = _ref_conv1d(h, w, emulate_bf16)
        mean = jnp.mean(y, axis=(0, 2), keepdims=True)
        var = jnp.mean(jnp.square(y - mean), axis=(0, 2), keepdims=True)
        y = (y - mean) / jnp.sqrt(var + EPS)
        h = jnp.maximum(y * gamma[None, :, None] + beta[None, :, None], 0.0)
    w, bias = raw_params[4]
    y = _ref_conv1d(h, w, emulate_bf16) + bias[None, :, None]
    y = jnp.mean(y, axis=2)
    return y.reshape(y.shape[0], -1, 1, 1)


# ----------------------------------- main ------------------------------------

if __name__ == "__main__":
    key = jax.random.PRNGKey(0)
    k_x, k_p = jax.random.split(key)

    batch = 2
    input_channel = 4
    channels = (8, 8, 16, 16)
    output_channel = 8
    length = 64  # 64 -> 32 -> 16 -> 8 -> 4 -> 2 through the five stride-2 convs

    x = jax.random.normal(k_x, (batch, input_channel, length), jnp.float32)
    kparams, raw_params = init_params(k_p, input_channel, channels, output_channel)

    out = jax.jit(voice_embed_net)(kparams, x)
    out = jax.block_until_ready(out)
    assert out.shape == (batch, output_channel, 1, 1), out.shape
    assert out.dtype == jnp.float32

    # Structural check: reference emulating the kernel's bf16-in / f32-acc MXU
    # numerics -- must match tightly (only summation-order level differences).
    ref_bf16 = reference_forward(raw_params, x, emulate_bf16=True)
    np.testing.assert_allclose(np.asarray(out), np.asarray(ref_bf16),
                               rtol=2e-3, atol=2e-3)

    # Accuracy check vs. the full-f32 (PyTorch train-mode semantics) reference;
    # tolerance sized for bf16 input rounding (~2^-8 relative, 5 layers deep).
    ref_f32 = reference_forward(raw_params, x, emulate_bf16=False)
    np.testing.assert_allclose(np.asarray(out), np.asarray(ref_f32),
                               rtol=3e-2, atol=3e-2)

    print("KERNEL_OK")
</pallas_src>

<mosaic_0001>
module attributes {stable_mosaic.version = 11 : i64} {
  func.func @kernel(%arg0: memref<128x4xf32, #tpu.memory_space<vmem>>, %arg1: memref<12x8xbf16, #tpu.memory_space<vmem>>, %arg2: memref<1x8xf32, #tpu.memory_space<vmem>>, %arg3: memref<1x8xf32, #tpu.memory_space<vmem>>, %arg4: memref<64x1xf32, #tpu.memory_space<vmem>>, %arg5: memref<24x8xbf16, #tpu.memory_space<vmem>>, %arg6: memref<1x8xf32, #tpu.memory_space<vmem>>, %arg7: memref<1x8xf32, #tpu.memory_space<vmem>>, %arg8: memref<32x1xf32, #tpu.memory_space<vmem>>, %arg9: memref<24x16xbf16, #tpu.memory_space<vmem>>, %arg10: memref<1x16xf32, #tpu.memory_space<vmem>>, %arg11: memref<1x16xf32, #tpu.memory_space<vmem>>, %arg12: memref<16x1xf32, #tpu.memory_space<vmem>>, %arg13: memref<48x16xbf16, #tpu.memory_space<vmem>>, %arg14: memref<1x16xf32, #tpu.memory_space<vmem>>, %arg15: memref<1x16xf32, #tpu.memory_space<vmem>>, %arg16: memref<8x1xf32, #tpu.memory_space<vmem>>, %arg17: memref<48x8xbf16, #tpu.memory_space<vmem>>, %arg18: memref<1x8xf32, #tpu.memory_space<vmem>>, %arg19: memref<4x1xf32, #tpu.memory_space<vmem>>, %arg20: memref<2x8xf32, #tpu.memory_space<vmem>>, %arg21: memref<129x4xf32, #tpu.memory_space<vmem>>, %arg22: memref<65x8xf32, #tpu.memory_space<vmem>>, %arg23: memref<33x8xf32, #tpu.memory_space<vmem>>, %arg24: memref<17x16xf32, #tpu.memory_space<vmem>>, %arg25: memref<9x16xf32, #tpu.memory_space<vmem>>, %arg26: memref<64x12xf32, #tpu.memory_space<vmem>>, %arg27: memref<32x24xf32, #tpu.memory_space<vmem>>, %arg28: memref<16x24xf32, #tpu.memory_space<vmem>>, %arg29: memref<8x48xf32, #tpu.memory_space<vmem>>, %arg30: memref<4x48xf32, #tpu.memory_space<vmem>>, %arg31: memref<4x8xf32, #tpu.memory_space<vmem>>) attributes {dimension_semantics = [], scalar_prefetch = 0 : i64, scratch_operands = 11 : i64, tpu.core_type = #tpu.core_type<tc>} {
    %cst = arith.constant 0.000000e+00 : f32
    %0 = vector.broadcast %cst : f32 to vector<1x4xf32>
    %c0 = arith.constant 0 : index
    %c0_0 = arith.constant 0 : index
    %1 = vector.load %arg21[%c0, %c0_0] : memref<129x4xf32, #tpu.memory_space<vmem>>, vector<1x4xf32>
    tpu.vector_store %arg21[%c0, %c0_0], %0 {strides = array<i32>} : memref<129x4xf32, #tpu.memory_space<vmem>>, vector<1x4xf32>,
    %c0_1 = arith.constant 0 : index
    %c0_2 = arith.constant 0 : index
    %2 = vector.load %arg0[%c0_1, %c0_2] : memref<128x4xf32, #tpu.memory_space<vmem>>, vector<128x4xf32>
    %c1 = arith.constant 1 : index
    %c0_3 = arith.constant 0 : index
    %3 = vector.load %arg21[%c1, %c0_3] : memref<129x4xf32, #tpu.memory_space<vmem>>, vector<128x4xf32>
    tpu.vector_store %arg21[%c1, %c0_3], %2 {strides = array<i32>} : memref<129x4xf32, #tpu.memory_space<vmem>>, vector<128x4xf32>,
    %c0_4 = arith.constant 0 : index
    %c0_5 = arith.constant 0 : index
    %4 = tpu.strided_load %arg21[%c0_4, %c0_5] {strides = array<i32: 2, 1>} : memref<129x4xf32, #tpu.memory_space<vmem>>, vector<64x4xf32>
    %c0_6 = arith.constant 0 : index
    %c0_7 = arith.constant 0 : index
    %5 = vector.load %arg4[%c0_6, %c0_7] : memref<64x1xf32, #tpu.memory_space<vmem>>, vector<64x1xf32>
    %6 = vector.broadcast %5 : vector<64x1xf32> to vector<64x4xf32>
    %7 = arith.mulf %4, %6 : vector<64x4xf32>
    %c1_8 = arith.constant 1 : index
    %c0_9 = arith.constant 0 : index
    %8 = tpu.strided_load %arg21[%c1_8, %c0_9] {strides = array<i32: 2, 1>} : memref<129x4xf32, #tpu.memory_space<vmem>>, vector<64x4xf32>
    %c2 = arith.constant 2 : index
    %c0_10 = arith.constant 0 : index
    %9 = tpu.strided_load %arg21[%c2, %c0_10] {strides = array<i32: 2, 1>} : memref<129x4xf32, #tpu.memory_space<vmem>>, vector<64x4xf32>
    %c0_11 = arith.constant 0 : index
    %c0_12 = arith.constant 0 : index
    %10 = vector.load %arg26[%c0_11, %c0_12] : memref<64x12xf32, #tpu.memory_space<vmem>>, vector<64x4xf32>
    tpu.vector_store %arg26[%c0_11, %c0_12], %7 {strides = array<i32>} : memref<64x12xf32, #tpu.memory_space<vmem>>, vector<64x4xf32>,
    %c0_13 = arith.constant 0 : index
    %c4 = arith.constant 4 : index
    %11 = vector.load %arg26[%c0_13, %c4] : memref<64x12xf32, #tpu.memory_space<vmem>>, vector<64x4xf32>
    tpu.vector_store %arg26[%c0_13, %c4], %8 {strides = array<i32>} : memref<64x12xf32, #tpu.memory_space<vmem>>, vector<64x4xf32>,
    %c0_14 = arith.constant 0 : index
    %c8 = arith.constant 8 : index
    %12 = vector.load %arg26[%c0_14, %c8] : memref<64x12xf32, #tpu.memory_space<vmem>>, vector<64x4xf32>
    tpu.vector_store %arg26[%c0_14, %c8], %9 {strides = array<i32>} : memref<64x12xf32, #tpu.memory_space<vmem>>, vector<64x4xf32>,
    %c0_15 = arith.constant 0 : index
    %c0_16 = arith.constant 0 : index
    %13 = vector.load %arg26[%c0_15, %c0_16] : memref<64x12xf32, #tpu.memory_space<vmem>>, vector<64x12xf32>
    %14 = arith.truncf %13 : vector<64x12xf32> to vector<64x12xbf16>
    %c0_17 = arith.constant 0 : index
    %c0_18 = arith.constant 0 : index
    %15 = vector.load %arg1[%c0_17, %c0_18] : memref<12x8xbf16, #tpu.memory_space<vmem>>, vector<12x8xbf16>
    %cst_19 = arith.constant dense<0.000000e+00> : vector<64x8xf32>
    %16 = tpu.matmul %14, %15, %cst_19 {dimension_numbers = #tpu.dot_dimension_numbers<[1], [0], [0], [1], [0, 0, 1, 1], [], []>} : vector<64x12xbf16>, vector<12x8xbf16>, vector<64x8xf32> -> vector<64x8xf32>
    %cst_20 = arith.constant dense<0.000000e+00> : vector<8xf32>
    %17 = vector.multi_reduction <add>, %16, %cst_20 [0] : vector<64x8xf32> to vector<8xf32>
    %18 = vector.shape_cast %17 : vector<8xf32> to vector<1x8xf32>
    %19 = arith.mulf %16, %16 : vector<64x8xf32>
    %cst_21 = arith.constant dense<0.000000e+00> : vector<8xf32>
    %20 = vector.multi_reduction <add>, %19, %cst_21 [0] : vector<64x8xf32> to vector<8xf32>
    %21 = vector.shape_cast %20 : vector<8xf32> to vector<1x8xf32>
    %cst_22 = arith.constant 1.562500e-02 : f32
    %22 = vector.broadcast %cst_22 : f32 to vector<1x8xf32>
    %23 = arith.mulf %18, %22 : vector<1x8xf32>
    %cst_23 = arith.constant 1.562500e-02 : f32
    %24 = vector.broadcast %cst_23 : f32 to vector<1x8xf32>
    %25 = arith.mulf %21, %24 : vector<1x8xf32>
    %26 = arith.mulf %23, %23 : vector<1x8xf32>
    %27 = arith.subf %25, %26 : vector<1x8xf32>
    %c0_24 = arith.constant 0 : index
    %c0_25 = arith.constant 0 : index
    %28 = vector.load %arg2[%c0_24, %c0_25] : memref<1x8xf32, #tpu.memory_space<vmem>>, vector<1x8xf32>
    %cst_26 = arith.constant 9.99999974E-6 : f32
    %29 = vector.broadcast %cst_26 : f32 to vector<1x8xf32>
    %30 = arith.addf %27, %29 : vector<1x8xf32>
    %31 = math.rsqrt %30 : vector<1x8xf32>
    %32 = arith.mulf %28, %31 : vector<1x8xf32>
    %c0_27 = arith.constant 0 : index
    %c0_28 = arith.constant 0 : index
    %33 = vector.load %arg3[%c0_27, %c0_28] : memref<1x8xf32, #tpu.memory_space<vmem>>, vector<1x8xf32>
    %34 = arith.mulf %23, %32 : vector<1x8xf32>
    %35 = arith.subf %33, %34 : vector<1x8xf32>
    %36 = vector.broadcast %32 : vector<1x8xf32> to vector<64x8xf32>
    %37 = arith.mulf %16, %36 : vector<64x8xf32>
    %38 = vector.broadcast %35 : vector<1x8xf32> to vector<64x8xf32>
    %39 = arith.addf %37, %38 : vector<64x8xf32>
    %cst_29 = arith.constant 0.000000e+00 : f32
    %40 = vector.broadcast %cst_29 : f32 to vector<64x8xf32>
    %41 = arith.maximumf %39, %40 : vector<64x8xf32>
    %cst_30 = arith.constant 0.000000e+00 : f32
    %42 = vector.broadcast %cst_30 : f32 to vector<1x8xf32>
    %c0_31 = arith.constant 0 : index
    %c0_32 = arith.constant 0 : index
    %43 = vector.load %arg22[%c0_31, %c0_32] : memref<65x8xf32, #tpu.memory_space<vmem>>, vector<1x8xf32>
    tpu.vector_store %arg22[%c0_31, %c0_32], %42 {strides = array<i32>} : memref<65x8xf32, #tpu.memory_space<vmem>>, vector<1x8xf32>,
    %c1_33 = arith.constant 1 : index
    %c0_34 = arith.constant 0 : index
    %44 = vector.load %arg22[%c1_33, %c0_34] : memref<65x8xf32, #tpu.memory_space<vmem>>, vector<64x8xf32>
    tpu.vector_store %arg22[%c1_33, %c0_34], %41 {strides = array<i32>} : memref<65x8xf32, #tpu.memory_space<vmem>>, vector<64x8xf32>,
    %c0_35 = arith.constant 0 : index
    %c0_36 = arith.constant 0 : index
    %45 = tpu.strided_load %arg22[%c0_35, %c0_36] {strides = array<i32: 2, 1>} : memref<65x8xf32, #tpu.memory_space<vmem>>, vector<32x8xf32>
    %c0_37 = arith.constant 0 : index
    %c0_38 = arith.constant 0 : index
    %46 = vector.load %arg8[%c0_37, %c0_38] : memref<32x1xf32, #tpu.memory_space<vmem>>, vector<32x1xf32>
    %47 = vector.broadcast %46 : vector<32x1xf32> to vector<32x8xf32>
    %48 = arith.mulf %45, %47 : vector<32x8xf32>
    %c1_39 = arith.constant 1 : index
    %c0_40 = arith.constant 0 : index
    %49 = tpu.strided_load %arg22[%c1_39, %c0_40] {strides = array<i32: 2, 1>} : memref<65x8xf32, #tpu.memory_space<vmem>>, vector<32x8xf32>
    %c2_41 = arith.constant 2 : index
    %c0_42 = arith.constant 0 : index
    %50 = tpu.strided_load %arg22[%c2_41, %c0_42] {strides = array<i32: 2, 1>} : memref<65x8xf32, #tpu.memory_space<vmem>>, vector<32x8xf32>
    %c0_43 = arith.constant 0 : index
    %c0_44 = arith.constant 0 : index
    %51 = vector.load %arg27[%c0_43, %c0_44] : memref<32x24xf32, #tpu.memory_space<vmem>>, vector<32x8xf32>
    tpu.vector_store %arg27[%c0_43, %c0_44], %48 {strides = array<i32>} : memref<32x24xf32, #tpu.memory_space<vmem>>, vector<32x8xf32>,
    %c0_45 = arith.constant 0 : index
    %c8_46 = arith.constant 8 : index
    %52 = vector.load %arg27[%c0_45, %c8_46] : memref<32x24xf32, #tpu.memory_space<vmem>>, vector<32x8xf32>
    tpu.vector_store %arg27[%c0_45, %c8_46], %49 {strides = array<i32>} : memref<32x24xf32, #tpu.memory_space<vmem>>, vector<32x8xf32>,
    %c0_47 = arith.constant 0 : index
    %c16 = arith.constant 16 : index
    %53 = vector.load %arg27[%c0_47, %c16] : memref<32x24xf32, #tpu.memory_space<vmem>>, vector<32x8xf32>
    tpu.vector_store %arg27[%c0_47, %c16], %50 {strides = array<i32>} : memref<32x24xf32, #tpu.memory_space<vmem>>, vector<32x8xf32>,
    %c0_48 = arith.constant 0 : index
    %c0_49 = arith.constant 0 : index
    %54 = vector.load %arg27[%c0_48, %c0_49] : memref<32x24xf32, #tpu.memory_space<vmem>>, vector<32x24xf32>
    %55 = arith.truncf %54 : vector<32x24xf32> to vector<32x24xbf16>
    %c0_50 = arith.constant 0 : index
    %c0_51 = arith.constant 0 : index
    %56 = vector.load %arg5[%c0_50, %c0_51] : memref<24x8xbf16, #tpu.memory_space<vmem>>, vector<24x8xbf16>
    %cst_52 = arith.constant dense<0.000000e+00> : vector<32x8xf32>
    %57 = tpu.matmul %55, %56, %cst_52 {dimension_numbers = #tpu.dot_dimension_numbers<[1], [0], [0], [1], [0, 0, 1, 1], [], []>} : vector<32x24xbf16>, vector<24x8xbf16>, vector<32x8xf32> -> vector<32x8xf32>
    %cst_53 = arith.constant dense<0.000000e+00> : vector<8xf32>
    %58 = vector.multi_reduction <add>, %57, %cst_53 [0] : vector<32x8xf32> to vector<8xf32>
    %59 = vector.shape_cast %58 : vector<8xf32> to vector<1x8xf32>
    %60 = arith.mulf %57, %57 : vector<32x8xf32>
    %cst_54 = arith.constant dense<0.000000e+00> : vector<8xf32>
    %61 = vector.multi_reduction <add>, %60, %cst_54 [0] : vector<32x8xf32> to vector<8xf32>
    %62 = vector.shape_cast %61 : vector<8xf32> to vector<1x8xf32>
    %cst_55 = arith.constant 3.125000e-02 : f32
    %63 = vector.broadcast %cst_55 : f32 to vector<1x8xf32>
    %64 = arith.mulf %59, %63 : vector<1x8xf32>
    %cst_56 = arith.constant 3.125000e-02 : f32
    %65 = vector.broadcast %cst_56 : f32 to vector<1x8xf32>
    %66 = arith.mulf %62, %65 : vector<1x8xf32>
    %67 = arith.mulf %64, %64 : vector<1x8xf32>
    %68 = arith.subf %66, %67 : vector<1x8xf32>
    %c0_57 = arith.constant 0 : index
    %c0_58 = arith.constant 0 : index
    %69 = vector.load %arg6[%c0_57, %c0_58] : memref<1x8xf32, #tpu.memory_space<vmem>>, vector<1x8xf32>
    %cst_59 = arith.constant 9.99999974E-6 : f32
    %70 = vector.broadcast %cst_59 : f32 to vector<1x8xf32>
    %71 = arith.addf %68, %70 : vector<1x8xf32>
    %72 = math.rsqrt %71 : vector<1x8xf32>
    %73 = arith.mulf %69, %72 : vector<1x8xf32>
    %c0_60 = arith.constant 0 : index
    %c0_61 = arith.constant 0 : index
    %74 = vector.load %arg7[%c0_60, %c0_61] : memref<1x8xf32, #tpu.memory_space<vmem>>, vector<1x8xf32>
    %75 = arith.mulf %64, %73 : vector<1x8xf32>
    %76 = arith.subf %74, %75 : vector<1x8xf32>
    %77 = vector.broadcast %73 : vector<1x8xf32> to vector<32x8xf32>
    %78 = arith.mulf %57, %77 : vector<32x8xf32>
    %79 = vector.broadcast %76 : vector<1x8xf32> to vector<32x8xf32>
    %80 = arith.addf %78, %79 : vector<32x8xf32>
    %cst_62 = arith.constant 0.000000e+00 : f32
    %81 = vector.broadcast %cst_62 : f32 to vector<32x8xf32>
    %82 = arith.maximumf %80, %81 : vector<32x8xf32>
    %cst_63 = arith.constant 0.000000e+00 : f32
    %83 = vector.broadcast %cst_63 : f32 to vector<1x8xf32>
    %c0_64 = arith.constant 0 : index
    %c0_65 = arith.constant 0 : index
    %84 = vector.load %arg23[%c0_64, %c0_65] : memref<33x8xf32, #tpu.memory_space<vmem>>, vector<1x8xf32>
    tpu.vector_store %arg23[%c0_64, %c0_65], %83 {strides = array<i32>} : memref<33x8xf32, #tpu.memory_space<vmem>>, vector<1x8xf32>,
    %c1_66 = arith.constant 1 : index
    %c0_67 = arith.constant 0 : index
    %85 = vector.load %arg23[%c1_66, %c0_67] : memref<33x8xf32, #tpu.memory_space<vmem>>, vector<32x8xf32>
    tpu.vector_store %arg23[%c1_66, %c0_67], %82 {strides = array<i32>} : memref<33x8xf32, #tpu.memory_space<vmem>>, vector<32x8xf32>,
    %c0_68 = arith.constant 0 : index
    %c0_69 = arith.constant 0 : index
    %86 = tpu.strided_load %arg23[%c0_68, %c0_69] {strides = array<i32: 2, 1>} : memref<33x8xf32, #tpu.memory_space<vmem>>, vector<16x8xf32>
    %c0_70 = arith.constant 0 : index
    %c0_71 = arith.constant 0 : index
    %87 = vector.load %arg12[%c0_70, %c0_71] : memref<16x1xf32, #tpu.memory_space<vmem>>, vector<16x1xf32>
    %88 = vector.broadcast %87 : vector<16x1xf32> to vector<16x8xf32>
    %89 = arith.mulf %86, %88 : vector<16x8xf32>
    %c1_72 = arith.constant 1 : index
    %c0_73 = arith.constant 0 : index
    %90 = tpu.strided_load %arg23[%c1_72, %c0_73] {strides = array<i32: 2, 1>} : memref<33x8xf32, #tpu.memory_space<vmem>>, vector<16x8xf32>
    %c2_74 = arith.constant 2 : index
    %c0_75 = arith.constant 0 : index
    %91 = tpu.strided_load %arg23[%c2_74, %c0_75] {strides = array<i32: 2, 1>} : memref<33x8xf32, #tpu.memory_space<vmem>>, vector<16x8xf32>
    %c0_76 = arith.constant 0 : index
    %c0_77 = arith.constant 0 : index
    %92 = vector.load %arg28[%c0_76, %c0_77] : memref<16x24xf32, #tpu.memory_space<vmem>>, vector<16x8xf32>
    tpu.vector_store %arg28[%c0_76, %c0_77], %89 {strides = array<i32>} : memref<16x24xf32, #tpu.memory_space<vmem>>, vector<16x8xf32>,
    %c0_78 = arith.constant 0 : index
    %c8_79 = arith.constant 8 : index
    %93 = vector.load %arg28[%c0_78, %c8_79] : memref<16x24xf32, #tpu.memory_space<vmem>>, vector<16x8xf32>
    tpu.vector_store %arg28[%c0_78, %c8_79], %90 {strides = array<i32>} : memref<16x24xf32, #tpu.memory_space<vmem>>, vector<16x8xf32>,
    %c0_80 = arith.constant 0 : index
    %c16_81 = arith.constant 16 : index
    %94 = vector.load %arg28[%c0_80, %c16_81] : memref<16x24xf32, #tpu.memory_space<vmem>>, vector<16x8xf32>
    tpu.vector_store %arg28[%c0_80, %c16_81], %91 {strides = array<i32>} : memref<16x24xf32, #tpu.memory_space<vmem>>, vector<16x8xf32>,
    %c0_82 = arith.constant 0 : index
    %c0_83 = arith.constant 0 : index
    %95 = vector.load %arg28[%c0_82, %c0_83] : memref<16x24xf32, #tpu.memory_space<vmem>>, vector<16x24xf32>
    %96 = arith.truncf %95 : vector<16x24xf32> to vector<16x24xbf16>
    %c0_84 = arith.constant 0 : index
    %c0_85 = arith.constant 0 : index
    %97 = vector.load %arg9[%c0_84, %c0_85] : memref<24x16xbf16, #tpu.memory_space<vmem>>, vector<24x16xbf16>
    %cst_86 = arith.constant dense<0.000000e+00> : vector<16x16xf32>
    %98 = tpu.matmul %96, %97, %cst_86 {dimension_numbers = #tpu.dot_dimension_numbers<[1], [0], [0], [1], [0, 0, 1, 1], [], []>} : vector<16x24xbf16>, vector<24x16xbf16>, vector<16x16xf32> -> vector<16x16xf32>
    %cst_87 = arith.constant dense<0.000000e+00> : vector<16xf32>
    %99 = vector.multi_reduction <add>, %98, %cst_87 [0] : vector<16x16xf32> to vector<16xf32>
    %100 = vector.shape_cast %99 : vector<16xf32> to vector<1x16xf32>
    %101 = arith.mulf %98, %98 : vector<16x16xf32>
    %cst_88 = arith.constant dense<0.000000e+00> : vector<16xf32>
    %102 = vector.multi_reduction <add>, %101, %cst_88 [0] : vector<16x16xf32> to vector<16xf32>
    %103 = vector.shape_cast %102 : vector<16xf32> to vector<1x16xf32>
    %cst_89 = arith.constant 6.250000e-02 : f32
    %104 = vector.broadcast %cst_89 : f32 to vector<1x16xf32>
    %105 = arith.mulf %100, %104 : vector<1x16xf32>
    %cst_90 = arith.constant 6.250000e-02 : f32
    %106 = vector.broadcast %cst_90 : f32 to vector<1x16xf32>
    %107 = arith.mulf %103, %106 : vector<1x16xf32>
    %108 = arith.mulf %105, %105 : vector<1x16xf32>
    %109 = arith.subf %107, %108 : vector<1x16xf32>
    %c0_91 = arith.constant 0 : index
    %c0_92 = arith.constant 0 : index
    %110 = vector.load %arg10[%c0_91, %c0_92] : memref<1x16xf32, #tpu.memory_space<vmem>>, vector<1x16xf32>
    %cst_93 = arith.constant 9.99999974E-6 : f32
    %111 = vector.broadcast %cst_93 : f32 to vector<1x16xf32>
    %112 = arith.addf %109, %111 : vector<1x16xf32>
    %113 = math.rsqrt %112 : vector<1x16xf32>
    %114 = arith.mulf %110, %113 : vector<1x16xf32>
    %c0_94 = arith.constant 0 : index
    %c0_95 = arith.constant 0 : index
    %115 = vector.load %arg11[%c0_94, %c0_95] : memref<1x16xf32, #tpu.memory_space<vmem>>, vector<1x16xf32>
    %116 = arith.mulf %105, %114 : vector<1x16xf32>
    %117 = arith.subf %115, %116 : vector<1x16xf32>
    %118 = vector.broadcast %114 : vector<1x16xf32> to vector<16x16xf32>
    %119 = arith.mulf %98, %118 : vector<16x16xf32>
    %120 = vector.broadcast %117 : vector<1x16xf32> to vector<16x16xf32>
    %121 = arith.addf %119, %120 : vector<16x16xf32>
    %cst_96 = arith.constant 0.000000e+00 : f32
    %122 = vector.broadcast %cst_96 : f32 to vector<16x16xf32>
    %123 = arith.maximumf %121, %122 : vector<16x16xf32>
    %cst_97 = arith.constant 0.000000e+00 : f32
    %124 = vector.broadcast %cst_97 : f32 to vector<1x16xf32>
    %c0_98 = arith.constant 0 : index
    %c0_99 = arith.constant 0 : index
    %125 = vector.load %arg24[%c0_98, %c0_99] : memref<17x16xf32, #tpu.memory_space<vmem>>, vector<1x16xf32>
    tpu.vector_store %arg24[%c0_98, %c0_99], %124 {strides = array<i32>} : memref<17x16xf32, #tpu.memory_space<vmem>>, vector<1x16xf32>,
    %c1_100 = arith.constant 1 : index
    %c0_101 = arith.constant 0 : index
    %126 = vector.load %arg24[%c1_100, %c0_101] : memref<17x16xf32, #tpu.memory_space<vmem>>, vector<16x16xf32>
    tpu.vector_store %arg24[%c1_100, %c0_101], %123 {strides = array<i32>} : memref<17x16xf32, #tpu.memory_space<vmem>>, vector<16x16xf32>,
    %c0_102 = arith.constant 0 : index
    %c0_103 = arith.constant 0 : index
    %127 = tpu.strided_load %arg24[%c0_102, %c0_103] {strides = array<i32: 2, 1>} : memref<17x16xf32, #tpu.memory_space<vmem>>, vector<8x16xf32>
    %c0_104 = arith.constant 0 : index
    %c0_105 = arith.constant 0 : index
    %128 = vector.load %arg16[%c0_104, %c0_105] : memref<8x1xf32, #tpu.memory_space<vmem>>, vector<8x1xf32>
    %129 = vector.broadcast %128 : vector<8x1xf32> to vector<8x16xf32>
    %130 = arith.mulf %127, %129 : vector<8x16xf32>
    %c1_106 = arith.constant 1 : index
    %c0_107 = arith.constant 0 : index
    %131 = tpu.strided_load %arg24[%c1_106, %c0_107] {strides = array<i32: 2, 1>} : memref<17x16xf32, #tpu.memory_space<vmem>>, vector<8x16xf32>
    %c2_108 = arith.constant 2 : index
    %c0_109 = arith.constant 0 : index
    %132 = tpu.strided_load %arg24[%c2_108, %c0_109] {strides = array<i32: 2, 1>} : memref<17x16xf32, #tpu.memory_space<vmem>>, vector<8x16xf32>
    %c0_110 = arith.constant 0 : index
    %c0_111 = arith.constant 0 : index
    %133 = vector.load %arg29[%c0_110, %c0_111] : memref<8x48xf32, #tpu.memory_space<vmem>>, vector<8x16xf32>
    tpu.vector_store %arg29[%c0_110, %c0_111], %130 {strides = array<i32>} : memref<8x48xf32, #tpu.memory_space<vmem>>, vector<8x16xf32>,
    %c0_112 = arith.constant 0 : index
    %c16_113 = arith.constant 16 : index
    %134 = vector.load %arg29[%c0_112, %c16_113] : memref<8x48xf32, #tpu.memory_space<vmem>>, vector<8x16xf32>
    tpu.vector_store %arg29[%c0_112, %c16_113], %131 {strides = array<i32>} : memref<8x48xf32, #tpu.memory_space<vmem>>, vector<8x16xf32>,
    %c0_114 = arith.constant 0 : index
    %c32 = arith.constant 32 : index
    %135 = vector.load %arg29[%c0_114, %c32] : memref<8x48xf32, #tpu.memory_space<vmem>>, vector<8x16xf32>
    tpu.vector_store %arg29[%c0_114, %c32], %132 {strides = array<i32>} : memref<8x48xf32, #tpu.memory_space<vmem>>, vector<8x16xf32>,
    %c0_115 = arith.constant 0 : index
    %c0_116 = arith.constant 0 : index
    %136 = vector.load %arg29[%c0_115, %c0_116] : memref<8x48xf32, #tpu.memory_space<vmem>>, vector<8x48xf32>
    %137 = arith.truncf %136 : vector<8x48xf32> to vector<8x48xbf16>
    %c0_117 = arith.constant 0 : index
    %c0_118 = arith.constant 0 : index
    %138 = vector.load %arg13[%c0_117, %c0_118] : memref<48x16xbf16, #tpu.memory_space<vmem>>, vector<48x16xbf16>
    %cst_119 = arith.constant dense<0.000000e+00> : vector<8x16xf32>
    %139 = tpu.matmul %137, %138, %cst_119 {dimension_numbers = #tpu.dot_dimension_numbers<[1], [0], [0], [1], [0, 0, 1, 1], [], []>} : vector<8x48xbf16>, vector<48x16xbf16>, vector<8x16xf32> -> vector<8x16xf32>
    %cst_120 = arith.constant dense<0.000000e+00> : vector<16xf32>
    %140 = vector.multi_reduction <add>, %139, %cst_120 [0] : vector<8x16xf32> to vector<16xf32>
    %141 = vector.shape_cast %140 : vector<16xf32> to vector<1x16xf32>
    %142 = arith.mulf %139, %139 : vector<8x16xf32>
    %cst_121 = arith.constant dense<0.000000e+00> : vector<16xf32>
    %143 = vector.multi_reduction <add>, %142, %cst_121 [0] : vector<8x16xf32> to vector<16xf32>
    %144 = vector.shape_cast %143 : vector<16xf32> to vector<1x16xf32>
    %cst_122 = arith.constant 1.250000e-01 : f32
    %145 = vector.broadcast %cst_122 : f32 to vector<1x16xf32>
    %146 = arith.mulf %141, %145 : vector<1x16xf32>
    %cst_123 = arith.constant 1.250000e-01 : f32
    %147 = vector.broadcast %cst_123 : f32 to vector<1x16xf32>
    %148 = arith.mulf %144, %147 : vector<1x16xf32>
    %149 = arith.mulf %146, %146 : vector<1x16xf32>
    %150 = arith.subf %148, %149 : vector<1x16xf32>
    %c0_124 = arith.constant 0 : index
    %c0_125 = arith.constant 0 : index
    %151 = vector.load %arg14[%c0_124, %c0_125] : memref<1x16xf32, #tpu.memory_space<vmem>>, vector<1x16xf32>
    %cst_126 = arith.constant 9.99999974E-6 : f32
    %152 = vector.broadcast %cst_126 : f32 to vector<1x16xf32>
    %153 = arith.addf %150, %152 : vector<1x16xf32>
    %154 = math.rsqrt %153 : vector<1x16xf32>
    %155 = arith.mulf %151, %154 : vector<1x16xf32>
    %c0_127 = arith.constant 0 : index
    %c0_128 = arith.constant 0 : index
    %156 = vector.load %arg15[%c0_127, %c0_128] : memref<1x16xf32, #tpu.memory_space<vmem>>, vector<1x16xf32>
    %157 = arith.mulf %146, %155 : vector<1x16xf32>
    %158 = arith.subf %156, %157 : vector<1x16xf32>
    %159 = vector.broadcast %155 : vector<1x16xf32> to vector<8x16xf32>
    %160 = arith.mulf %139, %159 : vector<8x16xf32>
    %161 = vector.broadcast %158 : vector<1x16xf32> to vector<8x16xf32>
    %162 = arith.addf %160, %161 : vector<8x16xf32>
    %cst_129 = arith.constant 0.000000e+00 : f32
    %163 = vector.broadcast %cst_129 : f32 to vector<8x16xf32>
    %164 = arith.maximumf %162, %163 : vector<8x16xf32>
    %cst_130 = arith.constant 0.000000e+00 : f32
    %165 = vector.broadcast %cst_130 : f32 to vector<1x16xf32>
    %c0_131 = arith.constant 0 : index
    %c0_132 = arith.constant 0 : index
    %166 = vector.load %arg25[%c0_131, %c0_132] : memref<9x16xf32, #tpu.memory_space<vmem>>, vector<1x16xf32>
    tpu.vector_store %arg25[%c0_131, %c0_132], %165 {strides = array<i32>} : memref<9x16xf32, #tpu.memory_space<vmem>>, vector<1x16xf32>,
    %c1_133 = arith.constant 1 : index
    %c0_134 = arith.constant 0 : index
    %167 = vector.load %arg25[%c1_133, %c0_134] : memref<9x16xf32, #tpu.memory_space<vmem>>, vector<8x16xf32>
    tpu.vector_store %arg25[%c1_133, %c0_134], %164 {strides = array<i32>} : memref<9x16xf32, #tpu.memory_space<vmem>>, vector<8x16xf32>,
    %c0_135 = arith.constant 0 : index
    %c0_136 = arith.constant 0 : index
    %168 = tpu.strided_load %arg25[%c0_135, %c0_136] {strides = array<i32: 2, 1>} : memref<9x16xf32, #tpu.memory_space<vmem>>, vector<4x16xf32>
    %c0_137 = arith.constant 0 : index
    %c0_138 = arith.constant 0 : index
    %169 = vector.load %arg19[%c0_137, %c0_138] : memref<4x1xf32, #tpu.memory_space<vmem>>, vector<4x1xf32>
    %170 = vector.broadcast %169 : vector<4x1xf32> to vector<4x16xf32>
    %171 = arith.mulf %168, %170 : vector<4x16xf32>
    %c1_139 = arith.constant 1 : index
    %c0_140 = arith.constant 0 : index
    %172 = tpu.strided_load %arg25[%c1_139, %c0_140] {strides = array<i32: 2, 1>} : memref<9x16xf32, #tpu.memory_space<vmem>>, vector<4x16xf32>
    %c2_141 = arith.constant 2 : index
    %c0_142 = arith.constant 0 : index
    %173 = tpu.strided_load %arg25[%c2_141, %c0_142] {strides = array<i32: 2, 1>} : memref<9x16xf32, #tpu.memory_space<vmem>>, vector<4x16xf32>
    %c0_143 = arith.constant 0 : index
    %c0_144 = arith.constant 0 : index
    %174 = vector.load %arg30[%c0_143, %c0_144] : memref<4x48xf32, #tpu.memory_space<vmem>>, vector<4x16xf32>
    tpu.vector_store %arg30[%c0_143, %c0_144], %171 {strides = array<i32>} : memref<4x48xf32, #tpu.memory_space<vmem>>, vector<4x16xf32>,
    %c0_145 = arith.constant 0 : index
    %c16_146 = arith.constant 16 : index
    %175 = vector.load %arg30[%c0_145, %c16_146] : memref<4x48xf32, #tpu.memory_space<vmem>>, vector<4x16xf32>
    tpu.vector_store %arg30[%c0_145, %c16_146], %172 {strides = array<i32>} : memref<4x48xf32, #tpu.memory_space<vmem>>, vector<4x16xf32>,
    %c0_147 = arith.constant 0 : index
    %c32_148 = arith.constant 32 : index
    %176 = vector.load %arg30[%c0_147, %c32_148] : memref<4x48xf32, #tpu.memory_space<vmem>>, vector<4x16xf32>
    tpu.vector_store %arg30[%c0_147, %c32_148], %173 {strides = array<i32>} : memref<4x48xf32, #tpu.memory_space<vmem>>, vector<4x16xf32>,
    %c0_149 = arith.constant 0 : index
    %c0_150 = arith.constant 0 : index
    %177 = vector.load %arg30[%c0_149, %c0_150] : memref<4x48xf32, #tpu.memory_space<vmem>>, vector<4x48xf32>
    %178 = arith.truncf %177 : vector<4x48xf32> to vector<4x48xbf16>
    %c0_151 = arith.constant 0 : index
    %c0_152 = arith.constant 0 : index
    %179 = vector.load %arg17[%c0_151, %c0_152] : memref<48x8xbf16, #tpu.memory_space<vmem>>, vector<48x8xbf16>
    %cst_153 = arith.constant dense<0.000000e+00> : vector<4x8xf32>
    %180 = tpu.matmul %178, %179, %cst_153 {dimension_numbers = #tpu.dot_dimension_numbers<[1], [0], [0], [1], [0, 0, 1, 1], [], []>} : vector<4x48xbf16>, vector<48x8xbf16>, vector<4x8xf32> -> vector<4x8xf32>
    %c0_154 = arith.constant 0 : index
    %c0_155 = arith.constant 0 : index
    %181 = vector.load %arg31[%c0_154, %c0_155] : memref<4x8xf32, #tpu.memory_space<vmem>>, vector<4x8xf32>
    tpu.vector_store %arg31[%c0_154, %c0_155], %180 {strides = array<i32>} : memref<4x8xf32, #tpu.memory_space<vmem>>, vector<4x8xf32>,
    %c0_156 = arith.constant 0 : index
    %c0_157 = arith.constant 0 : index
    %182 = tpu.strided_load %arg31[%c0_156, %c0_157] {strides = array<i32: 2, 1>} : memref<4x8xf32, #tpu.memory_space<vmem>>, vector<2x8xf32>
    %c1_158 = arith.constant 1 : index
    %c0_159 = arith.constant 0 : index
    %183 = tpu.strided_load %arg31[%c1_158, %c0_159] {strides = array<i32: 2, 1>} : memref<4x8xf32, #tpu.memory_space<vmem>>, vector<2x8xf32>
    %184 = arith.addf %182, %183 : vector<2x8xf32>
    %cst_160 = arith.constant 5.000000e-01 : f32
    %185 = vector.broadcast %cst_160 : f32 to vector<2x8xf32>
    %186 = arith.mulf %184, %185 : vector<2x8xf32>
    %c0_161 = arith.constant 0 : index
    %c0_162 = arith.constant 0 : index
    %187 = vector.load %arg18[%c0_161, %c0_162] : memref<1x8xf32, #tpu.memory_space<vmem>>, vector<1x8xf32>
    %188 = vector.broadcast %187 : vector<1x8xf32> to vector<2x8xf32>
    %189 = arith.addf %186, %188 : vector<2x8xf32>
    %c0_163 = arith.constant 0 : index
    %c0_164 = arith.constant 0 : index
    %190 = vector.load %arg20[%c0_163, %c0_164] : memref<2x8xf32, #tpu.memory_space<vmem>>, vector<2x8xf32>
    tpu.vector_store %arg20[%c0_163, %c0_164], %189 {strides = array<i32>} : memref<2x8xf32, #tpu.memory_space<vmem>>, vector<2x8xf32>,
    return
  }
}

</mosaic_0001>

<bundles_post_ra>
// kernel: voice_embed_net.1
= control target key start
LH: loop header
LB: loop body
LE: loop exit
PB: predicated region body
PF: predicated region fallthrough
CT: control target
= control target key end

     0   :  { %s1801_s0 = inlined_call_operand.vmem [shape: f32[128,4], index: 0, kind: input, shape index: {}]   ;;  %s1802_s1 = inlined_call_operand.vmem [shape: bf16[12,8], index: 1, kind: input, shape index: {}]   ;;  %s1803_s2 = inlined_call_operand.vmem [shape: f32[1,8], index: 2, kind: input, shape index: {}]   ;;  %s1804_s3 = inlined_call_operand.vmem [shape: f32[1,8], index: 3, kind: input, shape index: {}]   ;;  %s1805_s4 = inlined_call_operand.vmem [shape: f32[64,1], index: 4, kind: input, shape index: {}]   ;;  %s1806_s5 = inlined_call_operand.vmem [shape: bf16[24,8], index: 5, kind: input, shape index: {}]   ;;  %s1807_s6 = inlined_call_operand.vmem [shape: f32[1,8], index: 6, kind: input, shape index: {}]   ;;  %s1808_s7 = inlined_call_operand.vmem [shape: f32[1,8], index: 7, kind: input, shape index: {}]   ;;  %s1809_s8 = inlined_call_operand.vmem [shape: f32[32,1], index: 8, kind: input, shape index: {}]   ;;  %s1810_s9 = inlined_call_operand.vmem [shape: bf16[24,16], index: 9, kind: input, shape index: {}]   ;;  %s1811_s10 = inlined_call_operand.vmem [shape: f32[1,16], index: 10, kind: input, shape index: {}]   ;;  %s1812_s11 = inlined_call_operand.vmem [shape: f32[1,16], index: 11, kind: input, shape index: {}]   ;;  %s1813_s12 = inlined_call_operand.vmem [shape: f32[16,1], index: 12, kind: input, shape index: {}]   ;;  %s1814_s13 = inlined_call_operand.vmem [shape: bf16[48,16], index: 13, kind: input, shape index: {}]   ;;  %s1815_s14 = inlined_call_operand.vmem [shape: f32[1,16], index: 14, kind: input, shape index: {}]   ;;  %s1816_s15 = inlined_call_operand.vmem [shape: f32[1,16], index: 15, kind: input, shape index: {}]   ;;  %s1817_s16 = inlined_call_operand.vmem [shape: f32[8,1], index: 16, kind: input, shape index: {}]   ;;  %s1818_s17 = inlined_call_operand.vmem [shape: bf16[48,8], index: 17, kind: input, shape index: {}]   ;;  %s1819_s18 = inlined_call_operand.vmem [shape: f32[1,8], index: 18, kind: input, shape index: {}]   ;;  %s1820_s19 = inlined_call_operand.vmem [shape: f32[4,1], index: 19, kind: input, shape index: {}]   ;;  %s1821_s20 = inlined_call_operand.hbm [shape: f32[2,8], index: 20, kind: output, shape index: {}]  }
   0x1   :  { %1824 = sst [smem:[#allocation16_spill]] %s1801_s0 }
   0x2   :  { %1825 = sst [smem:[#allocation17_spill]] %s1802_s1 }
   0x3   :  { %1826 = sst [smem:[#allocation18_spill]] %s1803_s2 }
   0x4   :  { %1827 = sst [smem:[#allocation19_spill]] %s1804_s3 }
   0x5   :  { %1828 = sst [smem:[#allocation20_spill]] %s1805_s4 }
   0x6   :  { %s1829_s23 = sld [smem:[#allocation20_spill]]  ;;  %vm85_vm0 = vcmask 31744   ;;  %v1316_v2 = vmov 0   ;;  %vm67_vm1 = vcmask 24576   ;;  %v1317_v6 = vmov 0.0   ;;  %s1318_s3 = smov 4  }
   0x7   :  { %1274 = vset.pattern.permute.xlu1 %v1316_v2  ;;  %1273 = vset.pattern.permute.xlu0 %v1316_v2  ;;  %s1830_s26 = sld [smem:[#allocation16_spill]]  ;;  %68 = vst.msk [vmem:[#allocation2] sm:$0x1] %vm67_vm1, %v1317_v6 }
   0xc   :  { %v119_v0 = vld [vmem:[%s1829_s23 + $0x10] sm:$0xff]  ;;  %v117_v1 = vld [vmem:[%s1829_s23] sm:$0xff]  ;;  %v120_v7 = vld [vmem:[%s1829_s23 + $0x18] sm:$0xff] }
   0xd   :  { %137 = vperm.xlu1 %1274, %v119_v0   ;;  %127 = vperm.xlu0 %1273, %v117_v1   ;;  %v71_v3 = vld [vmem:[%s1830_s26 + $0x10] sm:$0xff]  ;;  %v72_v4 = vld [vmem:[%s1830_s26 + $0x18] sm:$0xff]  ;;  %v69_v5 = vld [vmem:[%s1830_s26] sm:$0xff] }
   0xe   :  { %v118_v8 = vld [vmem:[%s1829_s23 + $0x8] sm:$0xff]  ;;  %88 = vst.msk [vmem:[#allocation2 + $0x11] sm:$0xff] %vm85_vm0, %v71_v3  ;;  %89 = vst.msk [vmem:[#allocation2 + $0x19] sm:$0xff] %vm85_vm0, %v72_v4  ;;  %v75_v10 = vld [vmem:[%s1830_s26 + $0x30] sm:$0xff] }
   0xf   :  { %v70_v9 = vld [vmem:[%s1830_s26 + $0x8] sm:$0xff]  ;;  %86 = vst.msk [vmem:[#allocation2 + $0x1] sm:$0xff] %vm85_vm0, %v69_v5  ;;  %v76_v11 = vld [vmem:[%s1830_s26 + $0x38] sm:$0xff]  ;;  %v73_v12 = vld [vmem:[%s1830_s26 + $0x20] sm:$0xff] }
  0x10   :  { %87 = vst.msk [vmem:[#allocation2 + $0x9] sm:$0xff] %vm85_vm0, %v70_v9  ;;  %v122_v13 = vld [vmem:[%s1829_s23 + $0x28] sm:$0xff]  ;;  %v121_v14 = vld [vmem:[%s1829_s23 + $0x20] sm:$0xff]  ;;  %92 = vst.msk [vmem:[#allocation2 + $0x31] sm:$0xff] %vm85_vm0, %v75_v10 }
  0x11   :  { %93 = vst.msk [vmem:[#allocation2 + $0x39] sm:$0xff] %vm85_vm0, %v76_v11  ;;  %v74_v15 = vld [vmem:[%s1830_s26 + $0x28] sm:$0xff]  ;;  %90 = vst.msk [vmem:[#allocation2 + $0x21] sm:$0xff] %vm85_vm0, %v73_v12  ;;  %v79_v16 = vld [vmem:[%s1830_s26 + $0x50] sm:$0xff]  ;;  %142 = vperm.xlu1 %1274, %v120_v7   ;;  %132 = vperm.xlu0 %1273, %v118_v8  }
  0x12   :  { %v80_v17 = vld [vmem:[%s1830_s26 + $0x58] sm:$0xff]  ;;  %91 = vst.msk [vmem:[#allocation2 + $0x29] sm:$0xff] %vm85_vm0, %v74_v15  ;;  %96 = vst.msk [vmem:[#allocation2 + $0x51] sm:$0xff] %vm85_vm0, %v79_v16  ;;  %v77_v18 = vld [vmem:[%s1830_s26 + $0x40] sm:$0xff] }
  0x13   :  { %97 = vst.msk [vmem:[#allocation2 + $0x59] sm:$0xff] %vm85_vm0, %v80_v17  ;;  %v78_v19 = vld [vmem:[%s1830_s26 + $0x48] sm:$0xff]  ;;  %v83_v20 = vld [vmem:[%s1830_s26 + $0x70] sm:$0xff]  ;;  %94 = vst.msk [vmem:[#allocation2 + $0x41] sm:$0xff] %vm85_vm0, %v77_v18 }
  0x14   :  { %95 = vst.msk [vmem:[#allocation2 + $0x49] sm:$0xff] %vm85_vm0, %v78_v19  ;;  %v84_v21 = vld [vmem:[%s1830_s26 + $0x78] sm:$0xff]  ;;  %100 = vst.msk [vmem:[#allocation2 + $0x71] sm:$0xff] %vm85_vm0, %v83_v20  ;;  %v81_v22 = vld [vmem:[%s1830_s26 + $0x60] sm:$0xff] }
  0x15   :  { %v82_v23 = vld [vmem:[%s1830_s26 + $0x68] sm:$0xff]  ;;  %101 = vst.msk [vmem:[#allocation2 + $0x79] sm:$0xff] %vm85_vm0, %v84_v21  ;;  %98 = vst.msk [vmem:[#allocation2 + $0x61] sm:$0xff] %vm85_vm0, %v81_v22  ;;  %152 = vperm.xlu1 %1274, %v122_v13   ;;  %147 = vperm.xlu0 %1273, %v121_v14   ;;  %v176_v24 = vld [vmem:[#allocation2 + $0x11] ss:$2 sm:$0xff] }
  0x16   :  { %99 = vst.msk [vmem:[#allocation2 + $0x69] sm:$0xff] %vm85_vm0, %v82_v23  ;;  %v124_v26 = vld [vmem:[%s1829_s23 + $0x38] sm:$0xff]  ;;  %v123_v27 = vld [vmem:[%s1829_s23 + $0x30] sm:$0xff] }
  0x17   :  { %v174_v25 = vld [vmem:[#allocation2 + $0x1] ss:$2 sm:$0xff]  ;;  %v192_v30 = vld [vmem:[#allocation2 + $0x12] ss:$2 sm:$0xff]  ;;  %v190_v31 = vld [vmem:[#allocation2 + $0x2] ss:$2 sm:$0xff] }
  0x18   :  { %v180_v28 = vld [vmem:[#allocation2 + $0x31] ss:$2 sm:$0xff] }
  0x19   :  { %223 = vrot.lane.b32.xlu1 %v176_v24, %s1318_s3  ;;  %221 = vrot.lane.b32.xlu0 %v174_v25, %s1318_s3  ;;  %v178_v29 = vld [vmem:[#allocation2 + $0x21] ss:$2 sm:$0xff] }
  0x1d   :  { %162 = vperm.xlu1 %1274, %v124_v26   ;;  %157 = vperm.xlu0 %1273, %v123_v27  }
  0x21   :  { %227 = vrot.lane.b32.xlu1 %v180_v28, %s1318_s3  ;;  %225 = vrot.lane.b32.xlu0 %v178_v29, %s1318_s3 }
  0x22   :  { %25 = vsyncpa [#allocation14], 0  ;;  %s1319_s29 = smov 8   ;;  %v196_v32 = vld [vmem:[#allocation2 + $0x32] ss:$2 sm:$0xff]  ;;  %s1831_s0 = sld [smem:[#allocation17_spill]] }
  0x23   :  { %v194_v33 = vld [vmem:[#allocation2 + $0x22] ss:$2 sm:$0xff]  ;;  %vm327_vm2 = vcmask 1045504   ;;  %v184_v35 = vld [vmem:[#allocation2 + $0x51] ss:$2 sm:$0xff]  ;;  %vm245_vm3 = vcmask 64544  }
  0x24   :  { %v182_v36 = vld [vmem:[#allocation2 + $0x41] ss:$2 sm:$0xff]  ;;  %v188_v38 = vld [vmem:[#allocation2 + $0x71] ss:$2 sm:$0xff]  ;;  %v200_v40 = vld [vmem:[#allocation2 + $0x52] ss:$2 sm:$0xff] }
  0x25   :  { %264 = vrot.lane.b32.xlu1 %v192_v30, %s1319_s29  ;;  %262 = vrot.lane.b32.xlu0 %v190_v31, %s1319_s29  ;;  %v186_v39 = vld [vmem:[#allocation2 + $0x61] ss:$2 sm:$0xff]  ;;  %v198_v41 = vld [vmem:[#allocation2 + $0x42] ss:$2 sm:$0xff]  ;;  %v204_v42 = vld [vmem:[#allocation2 + $0x72] ss:$2 sm:$0xff] }
  0x26   :  { %v202_v43 = vld [vmem:[#allocation2 + $0x62] ss:$2 sm:$0xff]  ;;  %v514_v46 = vld [vmem:[%s1809_s8 + $0x18] sm:$0xff]  ;;  %vm286_vm4 = vcmask 97344   ;;  %vm314_vm5 = vcmask 97280   ;;  %vm494_vm6 = vcmask 57344  }
  0x27   :  { %v512_v44 = vld [vmem:[%s1809_s8 + $0x8] sm:$0xff]  ;;  %v511_v45 = vld [vmem:[%s1809_s8] sm:$0xff]  ;;  %v513_v47 = vld [vmem:[%s1809_s8 + $0x10] sm:$0xff]  ;;  %495 = vst.msk [vmem:[#allocation3] sm:$0x1] %vm494_vm6, %v1317_v6  ;;  %vm396_vm7 = vcmask 64512  }
  0x28   :  { %v1275_v34 = vld [vmem:[%s1831_s0] sm:$0x3f]   ;;  %v108_v54 = vld [vmem:[#allocation2 + $0x30] ss:$2 sm:$0xff]  ;;  %744 = vst.msk [vmem:[#allocation4] sm:$0x1] %vm494_vm6, %v1317_v6 }
  0x29   :  { %268 = vrot.lane.b32.xlu1 %v196_v32, %s1319_s29  ;;  %266 = vrot.lane.b32.xlu0 %v194_v33, %s1319_s29  ;;  %v329_v37 = vsel %vm327_vm2, %v1275_v34, 0  ;;  %v106_v48 = vld [vmem:[#allocation2 + $0x20] ss:$2 sm:$0xff]  ;;  %v104_v55 = vld [vmem:[#allocation2 + $0x10] ss:$2 sm:$0xff]  ;;  %s1832_s26 = sld [smem:[#allocation18_spill]] }
  0x2a   :  { %1263 = vmatprep.subr.msk.bf16.mxu0 %vm327_vm2, %v1275_v34  ;;  %v102_v49 = vld [vmem:[#allocation2] ss:$2 sm:$0xff]  ;;  %v112_v60 = vld [vmem:[#allocation2 + $0x50] ss:$2 sm:$0xff]  ;;  %s1833_s30 = sld [smem:[#allocation19_spill]]  ;;  %vm626_vm8 = vcmask 1043456  }
  0x2b   :  { %1218 = vmatpush3.bf16.msra.mxu0 %v329_v37  ;;  %v110_v61 = vld [vmem:[#allocation2 + $0x40] ss:$2 sm:$0xff]  ;;  %v116_v4 = vld [vmem:[#allocation2 + $0x70] ss:$2 sm:$0xff]  ;;  %vm575_vm9 = vcmask 130112   ;;  %vm596_vm10 = vcmask 195712  }
  0x2c   :  { %1243 = vmatprep.subr.bf16.mxu0 %v1317_v6  ;;  %v114_v5 = vld [vmem:[#allocation2 + $0x60] ss:$2 sm:$0xff]  ;;  %vm619_vm11 = vcmask 195584   ;;  %vm1321_vm12 = vmmov 0   ;;  %vm908_vm13 = vcmask 122880   ;;  %vm858_vm14 = vcmask 130048  }
  0x2d   :  { %231 = vrot.lane.b32.xlu1 %v184_v35, %s1318_s3  ;;  %229 = vrot.lane.b32.xlu0 %v182_v36, %s1318_s3  ;;  %909 = vst.msk [vmem:[#allocation5] sm:$0x1] %vm908_vm13, %v1317_v6  ;;  %1048 = vst.msk [vmem:[#allocation6] sm:$0x1] %vm908_vm13, %v1317_v6  ;;  %vm929_vm15 = vcmask 261248   ;;  %vm963_vm1 = vcmask 392192  }
  0x2e   :  { %vm1062_vm2 = vcmask 125952   ;;  %vm1160_vm6 = vcmask 58368  }
  0x31   :  { %235 = vrot.lane.b32.xlu1 %v188_v38, %s1318_s3  ;;  %233 = vrot.lane.b32.xlu0 %v186_v39, %s1318_s3 }
  0x35   :  { %272 = vrot.lane.b32.xlu1 %v200_v40, %s1319_s29  ;;  %270 = vrot.lane.b32.xlu0 %v198_v41, %s1319_s29 }
  0x39   :  { %276 = vrot.lane.b32.xlu1 %v204_v42, %s1319_s29  ;;  %274 = vrot.lane.b32.xlu0 %v202_v43, %s1319_s29 }
  0x3d   :  { %522 = vperm.xlu1 %1274, %v512_v44   ;;  %517 = vperm.xlu0 %1273, %v511_v45  }
  0x41   :  { %532 = vperm.xlu1 %1274, %v514_v46   ;;  %527 = vperm.xlu0 %1273, %v513_v47  }
  0x88   :  { %v138_v50 = vpop.permute.xlu1 %137  ;;  %v128_v51 = vpop.permute.xlu0 %127 }
  0x89   :  { %v167_v52 = vmul.f32 %v138_v50, %v106_v48  ;;  %v165_v53 = vmul.f32 %v128_v51, %v102_v49 }
  0x8b   :  { %207 = vst.msk [vmem:[#allocation7 + $0x10] sm:$0xff] %vm85_vm0, %v167_v52  ;;  %205 = vst.msk [vmem:[#allocation7] sm:$0xff] %vm85_vm0, %v165_v53 }
  0x8c   :  { %v143_v56 = vpop.permute.xlu1 %142  ;;  %v133_v57 = vpop.permute.xlu0 %132 }
  0x8d   :  { %v168_v58 = vmul.f32 %v143_v56, %v108_v54  ;;  %v166_v59 = vmul.f32 %v133_v57, %v104_v55 }
  0x8f   :  { %208 = vst.msk [vmem:[#allocation7 + $0x18] sm:$0xff] %vm85_vm0, %v168_v58  ;;  %206 = vst.msk [vmem:[#allocation7 + $0x8] sm:$0xff] %vm85_vm0, %v166_v59 }
  0x90   :  { %v153_v62 = vpop.permute.xlu1 %152  ;;  %v148_v63 = vpop.permute.xlu0 %147 }
  0x91   :  { %v170_v0 = vmul.f32 %v153_v62, %v112_v60  ;;  %v169_v1 = vmul.f32 %v148_v63, %v110_v61 }
  0x93   :  { %210 = vst.msk [vmem:[#allocation7 + $0x28] sm:$0xff] %vm85_vm0, %v170_v0  ;;  %209 = vst.msk [vmem:[#allocation7 + $0x20] sm:$0xff] %vm85_vm0, %v169_v1 }
  0x94   :  { %v224_v2 = vpop.permute.xlu1 %223  ;;  %v222_v3 = vpop.permute.xlu0 %221 }
  0x95   :  { %247 = vst.msk [vmem:[#allocation7 + $0x8] sm:$0xff] %vm245_vm3, %v224_v2  ;;  %246 = vst.msk [vmem:[#allocation7] sm:$0xff] %vm245_vm3, %v222_v3 }
  0x98   :  { %v163_v7 = vpop.permute.xlu1 %162  ;;  %v158_v8 = vpop.permute.xlu0 %157 }
  0x99   :  { %v172_v9 = vmul.f32 %v163_v7, %v116_v4  ;;  %v171_v10 = vmul.f32 %v158_v8, %v114_v5 }
  0x9b   :  { %212 = vst.msk [vmem:[#allocation7 + $0x38] sm:$0xff] %vm85_vm0, %v172_v9  ;;  %211 = vst.msk [vmem:[#allocation7 + $0x30] sm:$0xff] %vm85_vm0, %v171_v10  ;;  %vm935_vm0 = vcmask 392448  }
  0x9c   :  { %v228_v11 = vpop.permute.xlu1 %227  ;;  %v226_v12 = vpop.permute.xlu0 %225 }
  0x9d   :  { %249 = vst.msk [vmem:[#allocation7 + $0x18] sm:$0xff] %vm245_vm3, %v228_v11  ;;  %248 = vst.msk [vmem:[#allocation7 + $0x10] sm:$0xff] %vm245_vm3, %v226_v12 }
  0xa0   :  { %v265_v13 = vpop.permute.xlu1 %264  ;;  %v263_v14 = vpop.permute.xlu0 %262 }
  0xa1   :  { %288 = vst.msk [vmem:[#allocation7 + $0x8] sm:$0xff] %vm286_vm4, %v265_v13  ;;  %287 = vst.msk [vmem:[#allocation7] sm:$0xff] %vm286_vm4, %v263_v14 }
  0xa4   :  { %v269_v15 = vpop.permute.xlu1 %268  ;;  %v267_v16 = vpop.permute.xlu0 %266 }
  0xa5   :  { %290 = vst.msk [vmem:[#allocation7 + $0x18] sm:$0xff] %vm286_vm4, %v269_v15  ;;  %289 = vst.msk [vmem:[#allocation7 + $0x10] sm:$0xff] %vm286_vm4, %v267_v16 }
  0xa8   :  { %v232_v17 = vpop.permute.xlu1 %231  ;;  %v230_v18 = vpop.permute.xlu0 %229  ;;  %v295_v19 = vld [vmem:[#allocation7] sm:$0xff]  ;;  %v296_v20 = vld [vmem:[#allocation7 + $0x8] sm:$0xff] }
  0xa9   :  { %251 = vst.msk [vmem:[#allocation7 + $0x28] sm:$0xff] %vm245_vm3, %v232_v17  ;;  %250 = vst.msk [vmem:[#allocation7 + $0x20] sm:$0xff] %vm245_vm3, %v230_v18  ;;  %v303_v21 = vpack.c.bf16 %v296_v20, %v295_v19 }
  0xab   :  { %1219 = vmatprep.mubr.msk.bf16.mxu0 %vm314_vm5, %v303_v21 }
  0xac   :  { %v236_v22 = vpop.permute.xlu1 %235  ;;  %v234_v23 = vpop.permute.xlu0 %233  ;;  %v297_v24 = vld [vmem:[#allocation7 + $0x10] sm:$0xff]  ;;  %v298_v25 = vld [vmem:[#allocation7 + $0x18] sm:$0xff] }
  0xad   :  { %253 = vst.msk [vmem:[#allocation7 + $0x38] sm:$0xff] %vm245_vm3, %v236_v22  ;;  %252 = vst.msk [vmem:[#allocation7 + $0x30] sm:$0xff] %vm245_vm3, %v234_v23  ;;  %v304_v26 = vpack.c.bf16 %v298_v25, %v297_v24  ;;  %vm1068_vm3 = vcmask 257152  }
  0xaf   :  { %1220 = vmatmul.mubr.msk.bf16.vlgmr.msra.gmra.mxu0 %vm314_vm5, %v304_v26 }
  0xb0   :  { %v273_v27 = vpop.permute.xlu1 %272  ;;  %v271_v28 = vpop.permute.xlu0 %270 }
  0xb1   :  { %292 = vst.msk [vmem:[#allocation7 + $0x28] sm:$0xff] %vm286_vm4, %v273_v27  ;;  %291 = vst.msk [vmem:[#allocation7 + $0x20] sm:$0xff] %vm286_vm4, %v271_v28 }
  0xb4   :  { %v277_v29 = vpop.permute.xlu1 %276  ;;  %v275_v30 = vpop.permute.xlu0 %274 }
  0xb5   :  { %294 = vst.msk [vmem:[#allocation7 + $0x38] sm:$0xff] %vm286_vm4, %v277_v29  ;;  %293 = vst.msk [vmem:[#allocation7 + $0x30] sm:$0xff] %vm286_vm4, %v275_v30  ;;  %vm1074_vm4 = vcmask 388352  }
  0xb8   :  { %v299_v31 = vld [vmem:[#allocation7 + $0x20] sm:$0xff]  ;;  %v300_v32 = vld [vmem:[#allocation7 + $0x28] sm:$0xff] }
  0xb9   :  { %v305_v33 = vpack.c.bf16 %v300_v32, %v299_v31 }
  0xbb   :  { %1223 = vmatprep.mubr.msk.bf16.mxu0 %vm314_vm5, %v305_v33 }
  0xbc   :  { %v301_v34 = vld [vmem:[#allocation7 + $0x30] sm:$0xff]  ;;  %v302_v35 = vld [vmem:[#allocation7 + $0x38] sm:$0xff] }
  0xbd   :  { %v306_v36 = vpack.c.bf16 %v302_v35, %v301_v34 }
  0xbf   :  { %1224 = vmatmul.mubr.msk.bf16.gmra.mxu0 %vm314_vm5, %v306_v36  ;;  %vm1145_vm5 = vcmask 60416  }
  0xc0   :  { %1249 = vmatprep.mubr.msk.bf16.mxu0 %vm1321_vm12, %v1317_v6 }
 0x16f   :  { %v1580_v37 = vpop.f32.mrf.mxu0 }
 0x170   :  { %v420_v47 = vmul.f32 %v1580_v37, %v1580_v37  ;;  %v400_v50 = vsel %vm396_vm7, %v1580_v37, 0.0 }
 0x171   :  { %v1582_v38 = vpop.f32.mrf.mxu0 }
 0x172   :  { %v418_v42 = vmul.f32 %v1582_v38, %v1582_v38  ;;  %v397_v44 = vsel %vm396_vm7, %v1582_v38, 0.0  ;;  %v429_v53 = vsel %vm396_vm7, %v420_v47, 0.0  ;;  %v455_v47 = vld [vmem:[%s1833_s30] sm:$0x1] }
 0x173   :  { %v1584_v39 = vpop.f32.mrf.mxu0 }
 0x174   :  { %v426_v48 = vsel %vm396_vm7, %v418_v42, 0.0  ;;  %v421_v54 = vmul.f32 %v1584_v39, %v1584_v39  ;;  %v402_v57 = vsel %vm396_vm7, %v1584_v39, 0.0 }
 0x175   :  { %v1586_v40 = vpop.f32.mrf.mxu0 }
 0x176   :  { %v419_v41 = vmul.f32 %v1586_v40, %v1586_v40  ;;  %v398_v43 = vsel %vm396_vm7, %v1586_v40, 0.0  ;;  %v431_v62 = vsel %vm396_vm7, %v421_v54, 0.0 }
 0x177   :  { %v399_v46 = vadd.f32 %v398_v43, %v397_v44  ;;  %v451_v43 = vld [vmem:[%s1832_s26] sm:$0x1]  ;;  %s1323_s26 = smov [#allocation13]  }
 0x178   :  { %v427_v45 = vsel %vm396_vm7, %v419_v41, 0.0  ;;  %v459_v41 = vlaneseq  ;;  %s1168_s4 = sshll.u32 %s1323_s26, 4  ;;  %s1169_s4 = int_to_ptr.vmem [resolvable:$true] %s1168_s4 }
 0x179   :  { %v428_v49 = vadd.f32 %v427_v45, %v426_v48  ;;  %v401_v51 = vadd.f32 %v400_v50, %v399_v46  ;;  %p1299_p1 = scmp.lt.s32.totalorder %s1169_s4, %s1169_s4 }
 0x17a   :  { %v460_v42 = vshrl.u32 %v459_v41, 7 }
 0x17b   :  { %v430_v55 = vadd.f32 %v429_v53, %v428_v49  ;;  %v403_v60 = vadd.f32 %v402_v57, %v401_v51 }
 0x17c   :  { %v1629_v44 = vsub.s32 0, %v460_v42 }
 0x17d   :  { %v432_v1 = vadd.f32 %v431_v62, %v430_v55 }
 0x17f   :  { %v1602_v52 = vpop.f32.mrf.mxu0 }
 0x180   :  { %v424_v3 = vmul.f32 %v1602_v52, %v1602_v52  ;;  %v408_v9 = vsel %vm396_vm7, %v1602_v52, 0.0 }
 0x181   :  { %v1607_v56 = vpop.f32.mrf.mxu0 }
 0x182   :  { %v404_v58 = vsel %vm396_vm7, %v1607_v56, 0.0  ;;  %v422_v59 = vmul.f32 %v1607_v56, %v1607_v56  ;;  %v437_v14 = vsel %vm396_vm7, %v424_v3, 0.0 }
 0x183   :  { %v1226_v61 = vpop.f32.mrf.mxu0  ;;  %v405_v0 = vadd.f32 %v404_v58, %v403_v60 }
 0x184   :  { %v433_v63 = vsel %vm396_vm7, %v422_v59, 0.0  ;;  %v425_v10 = vmul.f32 %v1226_v61, %v1226_v61  ;;  %v410_v15 = vsel %vm396_vm7, %v1226_v61, 0.0 }
 0x185   :  { %v384_v2 = vpop.f32.mrf.mxu0  ;;  %v434_v7 = vadd.f32 %v433_v63, %v432_v1 }
 0x186   :  { %v406_v4 = vsel %vm396_vm7, %v384_v2, 0.0  ;;  %v423_v5 = vmul.f32 %v384_v2, %v384_v2  ;;  %v439_v18 = vsel %vm396_vm7, %v425_v10, 0.0 }
 0x187   :  { %v407_v8 = vadd.f32 %v406_v4, %v405_v0 }
 0x188   :  { %v435_v11 = vsel %vm396_vm7, %v423_v5, 0.0 }
 0x189   :  { %v409_v12 = vadd.f32 %v408_v9, %v407_v8  ;;  %v436_v13 = vadd.f32 %v435_v11, %v434_v7 }
 0x18b   :  { %v411_v16 = vadd.f32 %v410_v15, %v409_v12  ;;  %v438_v17 = vadd.f32 %v437_v14, %v436_v13 }
 0x18d   :  { %v412_v19 = vrot.slane %v411_v16, 4  ;;  %v440_v20 = vadd.f32 %v439_v18, %v438_v17 }
 0x18f   :  { %v413_v21 = vadd.f32 %v412_v19, %v411_v16  ;;  %v441_v22 = vrot.slane %v440_v20, 4 }
 0x191   :  { %v414_v23 = vrot.slane %v413_v21, 2  ;;  %v442_v24 = vadd.f32 %v441_v22, %v440_v20 }
 0x193   :  { %v415_v25 = vadd.f32 %v414_v23, %v413_v21  ;;  %v443_v26 = vrot.slane %v442_v24, 2  ;;  %v1276_v23 = vld [vmem:[%s1806_s5 + $0x8] ss:$0 sps:$4 sm:$0xff]  }
 0x194   :  { %1264 = vmatprep.subr.msk.bf16.mxu1 %vm626_vm8, %v1276_v23 }
 0x195   :  { %v416_v27 = vrot.slane %v415_v25, 1  ;;  %v444_v28 = vadd.f32 %v443_v26, %v442_v24  ;;  %v1277_v24 = vld [vmem:[%s1806_s5] sm:$0xff]   ;;  %s1320_s5 = smov 16  }
 0x197   :  { %v417_v29 = vadd.f32 %v416_v27, %v415_v25  ;;  %v445_v30 = vrot.slane %v444_v28, 1  ;;  %v628_v27 = vsel %vm626_vm8, %v1276_v23, 0 }
 0x198   :  { %1228 = vmatpush3.bf16.msra.mxu1 %v628_v27 }
 0x199   :  { %v446_v31 = vadd.f32 %v445_v30, %v444_v28  ;;  %v447_v32 = vmul.f32 0.015625, %v417_v29  ;;  %1229 = vmatprep.subr.bf16.mxu1 %v1277_v24 }
 0x19b   :  { %v448_v33 = vmul.f32 0.015625, %v446_v31  ;;  %v449_v34 = vmul.f32 %v447_v32, %v447_v32 }
 0x19c   :  { %1230 = vmatpush3.bf16.msra.mxu1 %v1277_v24 }
 0x19d   :  { %v450_v35 = vsub.f32 %v448_v33, %v449_v34  ;;  %1235 = vmatprep.subr.bf16.mxu1 %v1317_v6  ;;  %v752_v33 = vld [vmem:[%s1813_s12] sm:$0xff] }
 0x19f   :  { %v452_v36 = vadd.f32 1e-05, %v450_v35 }
 0x1a1   :  { %1286 = vrsqrt.f32 %v452_v36 }
 0x1ae   :  { %v1287_v45 = vpop.eup %1286 }
 0x1af   :  { %v454_v46 = vmul.f32 %v1287_v45, %v451_v43 }
 0x1b1   :  { %v456_v48 = vmul.f32 %v454_v46, %v447_v32  ;;  %v462_v49 = vrot.slane %v454_v46, %v1629_v44  ;;  %v753_v32 = vld [vmem:[%s1813_s12 + $0x8] sm:$0xff] }
 0x1b3   :  { %v457_v50 = vsub.f32 %v455_v47, %v456_v48  ;;  %v469_v51 = vmul.f32 %v462_v49, %v384_v2  ;;  %v466_v54 = vmul.f32 %v1580_v37, %v462_v49  ;;  %v467_v55 = vmul.f32 %v1584_v39, %v462_v49 }
 0x1b4   :  { %v464_v57 = vmul.f32 %v462_v49, %v1582_v38  ;;  %v465_v58 = vmul.f32 %v462_v49, %v1586_v40  ;;  %v470_v59 = vmul.f32 %v1602_v52, %v462_v49  ;;  %v471_v60 = vmul.f32 %v1226_v61, %v462_v49  ;;  %v523_v52 = vpop.permute.xlu1 %522 }
 0x1b5   :  { %v476_v53 = vrot.slane %v457_v50, %v1629_v44  ;;  %v468_v62 = vmul.f32 %v462_v49, %v1607_v56  ;;  %v518_v56 = vpop.permute.xlu0 %517 }
 0x1b7   :  { %v483_v63 = vadd.f32 %v476_v53, %v469_v51  ;;  %v480_v0 = vadd.f32 %v476_v53, %v466_v54  ;;  %v481_v1 = vadd.f32 %v476_v53, %v467_v55  ;;  %v478_v3 = vadd.f32 %v476_v53, %v464_v57 }
 0x1b8   :  { %v479_v2 = vadd.f32 %v476_v53, %v465_v58  ;;  %v484_v4 = vadd.f32 %v476_v53, %v470_v59  ;;  %v485_v5 = vadd.f32 %v476_v53, %v471_v60  ;;  %v482_v7 = vadd.f32 %v476_v53, %v468_v62  ;;  %v533_v14 = vpop.permute.xlu1 %532 }
 0x1b9   :  { %v491_v37 = vmax.f32 %v483_v63, 0.0  ;;  %v488_v8 = vmax.f32 %v480_v0, 0.0  ;;  %v489_v39 = vmax.f32 %v481_v1, 0.0  ;;  %v486_v9 = vmax.f32 %v478_v3, 0.0  ;;  %v528_v18 = vpop.permute.xlu0 %527 }
 0x1ba   :  { %v487_v38 = vmax.f32 %v479_v2, 0.0  ;;  %v492_v10 = vmax.f32 %v484_v4, 0.0  ;;  %v493_v40 = vmax.f32 %v485_v5, 0.0  ;;  %v490_v11 = vmax.f32 %v482_v7, 0.0 }
 0x1bb   :  { %501 = vst.msk [vmem:[#allocation3 + $0x29] sm:$0xff] %vm396_vm7, %v491_v37  ;;  %498 = vst.msk [vmem:[#allocation3 + $0x11] sm:$0xff] %vm396_vm7, %v488_v8 }
 0x1bc   :  { %499 = vst.msk [vmem:[#allocation3 + $0x19] sm:$0xff] %vm396_vm7, %v489_v39  ;;  %496 = vst.msk [vmem:[#allocation3 + $0x1] sm:$0xff] %vm396_vm7, %v486_v9 }
 0x1bd   :  { %497 = vst.msk [vmem:[#allocation3 + $0x9] sm:$0xff] %vm396_vm7, %v487_v38  ;;  %502 = vst.msk [vmem:[#allocation3 + $0x31] sm:$0xff] %vm396_vm7, %v492_v10 }
 0x1be   :  { %503 = vst.msk [vmem:[#allocation3 + $0x39] sm:$0xff] %vm396_vm7, %v493_v40  ;;  %500 = vst.msk [vmem:[#allocation3 + $0x21] sm:$0xff] %vm396_vm7, %v490_v11 }
 0x1c3   :  { %v542_v61 = vld [vmem:[#allocation3 + $0x11] ss:$2 sm:$0xff]  ;;  %v550_v28 = vld [vmem:[#allocation3 + $0x12] ss:$2 sm:$0xff] }
 0x1c4   :  { %565 = vrot.lane.b32.xlu1 %v542_v61, %s1319_s29  ;;  %v540_v12 = vld [vmem:[#allocation3 + $0x1] ss:$2 sm:$0xff]  ;;  %v506_v15 = vld [vmem:[#allocation3 + $0x10] ss:$2 sm:$0xff]  ;;  %v504_v16 = vld [vmem:[#allocation3] ss:$2 sm:$0xff] }
 0x1c5   :  { %563 = vrot.lane.b32.xlu0 %v540_v12, %s1319_s29  ;;  %v546_v13 = vld [vmem:[#allocation3 + $0x31] ss:$2 sm:$0xff]  ;;  %v510_v17 = vld [vmem:[#allocation3 + $0x30] ss:$2 sm:$0xff]  ;;  %v536_v19 = vmul.f32 %v523_v52, %v506_v15  ;;  %v535_v20 = vmul.f32 %v518_v56, %v504_v16  ;;  %v508_v22 = vld [vmem:[#allocation3 + $0x20] ss:$2 sm:$0xff] }
 0x1c6   :  { %v538_v21 = vmul.f32 %v533_v14, %v510_v17  ;;  %v544_v25 = vld [vmem:[#allocation3 + $0x21] ss:$2 sm:$0xff]  ;;  %v537_v26 = vmul.f32 %v528_v18, %v508_v22  ;;  %v548_v29 = vld [vmem:[#allocation3 + $0x2] ss:$2 sm:$0xff]  ;;  %v554_v30 = vld [vmem:[#allocation3 + $0x32] ss:$2 sm:$0xff] }
 0x1c7   :  { %556 = vst.msk [vmem:[#allocation8 + $0x8] sm:$0xff] %vm396_vm7, %v536_v19  ;;  %555 = vst.msk [vmem:[#allocation8] sm:$0xff] %vm396_vm7, %v535_v20  ;;  %v552_v31 = vld [vmem:[#allocation3 + $0x22] ss:$2 sm:$0xff] }
 0x1c8   :  { %569 = vrot.lane.b32.xlu1 %v546_v13, %s1319_s29  ;;  %558 = vst.msk [vmem:[#allocation8 + $0x18] sm:$0xff] %vm396_vm7, %v538_v21  ;;  %557 = vst.msk [vmem:[#allocation8 + $0x10] sm:$0xff] %vm396_vm7, %v537_v26 }
 0x1c9   :  { %567 = vrot.lane.b32.xlu0 %v544_v25, %s1319_s29  ;;  %v713_v25 = vld [vmem:[%s1807_s6] sm:$0x1] }
 0x1cc   :  { %586 = vrot.lane.b32.xlu1 %v550_v28, %s1320_s5  ;;  %v717_v28 = vld [vmem:[%s1808_s7] sm:$0x1] }
 0x1cd   :  { %584 = vrot.lane.b32.xlu0 %v548_v29, %s1320_s5 }
 0x1d0   :  { %590 = vrot.lane.b32.xlu1 %v554_v30, %s1320_s5 }
 0x1d1   :  { %588 = vrot.lane.b32.xlu0 %v552_v31, %s1320_s5 }
 0x1d4   :  { %761 = vperm.xlu1 %1274, %v753_v32  }
 0x1d5   :  { %756 = vperm.xlu0 %1273, %v752_v33  }
 0x236   :  { %v566_v34 = vpop.permute.xlu1 %565 }
 0x237   :  { %577 = vst.msk [vmem:[#allocation8 + $0x8] sm:$0xff] %vm575_vm9, %v566_v34  ;;  %v564_v35 = vpop.permute.xlu0 %563 }
 0x238   :  { %576 = vst.msk [vmem:[#allocation8] sm:$0xff] %vm575_vm9, %v564_v35 }
 0x23a   :  { %v570_v36 = vpop.permute.xlu1 %569 }
 0x23b   :  { %579 = vst.msk [vmem:[#allocation8 + $0x18] sm:$0xff] %vm575_vm9, %v570_v36  ;;  %v568_v41 = vpop.permute.xlu0 %567 }
 0x23c   :  { %578 = vst.msk [vmem:[#allocation8 + $0x10] sm:$0xff] %vm575_vm9, %v568_v41 }
 0x23e   :  { %v587_v42 = vpop.permute.xlu1 %586 }
 0x23f   :  { %598 = vst.msk [vmem:[#allocation8 + $0x8] sm:$0xff] %vm596_vm10, %v587_v42  ;;  %v585_v43 = vpop.permute.xlu0 %584 }
 0x240   :  { %597 = vst.msk [vmem:[#allocation8] sm:$0xff] %vm596_vm10, %v585_v43 }
 0x242   :  { %v591_v45 = vpop.permute.xlu1 %590 }
 0x243   :  { %600 = vst.msk [vmem:[#allocation8 + $0x18] sm:$0xff] %vm596_vm10, %v591_v45  ;;  %v589_v46 = vpop.permute.xlu0 %588 }
 0x244   :  { %599 = vst.msk [vmem:[#allocation8 + $0x10] sm:$0xff] %vm596_vm10, %v589_v46 }
 0x246   :  { %v602_v47 = vld [vmem:[#allocation8 + $0x8] sm:$0xff] }
 0x247   :  { %v601_v48 = vld [vmem:[#allocation8] sm:$0xff] }
 0x248   :  { %v605_v49 = vpack.c.bf16 %v602_v47, %v601_v48 }
 0x24a   :  { %1231 = vmatprep.mubr.msk.bf16.mxu1 %vm619_vm11, %v605_v49  ;;  %v604_v50 = vld [vmem:[#allocation8 + $0x18] sm:$0xff] }
 0x24b   :  { %v603_v51 = vld [vmem:[#allocation8 + $0x10] sm:$0xff] }
 0x24c   :  { %v606_v53 = vpack.c.bf16 %v604_v50, %v603_v51  ;;  %v1278_v50 = vld [vmem:[%s1810_s9 + $0x8] ss:$0 sps:$4 sm:$0xff]  }
 0x24d   :  { %v815_v51 = vsel %vm626_vm8, %v1278_v50, 0 }
 0x24e   :  { %1232 = vmatmul.mubr.msk.bf16.vlgmr.msra.gmra.mxu1 %vm619_vm11, %v606_v53  ;;  %v1279_v53 = vld [vmem:[%s1810_s9] sm:$0xff]   ;;  %s1294_s9 = scalar_lea.vmem %s1169_s4, 32 }
 0x24f   :  { %1239 = vmatprep.mubr.msk.bf16.mxu1 %vm1321_vm12, %v1317_v6  ;;  %1236 = vmatpush3.bf16.msra.mxu1 %v815_v51  ;;  %v1281_v51 = vld [vmem:[%s1814_s13 + $0x8] sm:$0xff]   ;;  %p1295_p0 = scmp.ne.s32.totalorder %s1169_s4, %s1294_s9  ;;  %p1300_p2 = scmp.lt.s32.totalorder %s1294_s9, %s1294_s9 }
 0x250   :  { %1237 = vmatprep.subr.bf16.mxu1 %v1317_v6 }
 0x251   :  { %p1301_p3 = por %p1300_p2, %p1299_p1 }
 0x253   :  { %1238 = vmatpush3.bf16.msra.mxu1 %v1279_v53  ;;  %p1302_p4 = pnand %p1301_p3, %p1295_p0 }
 0x254   :  { %1253 = vmatprep.subr.bf16.mxu1 %v1317_v6 }
 0x30e   :  { %v1233_v54 = vpop.f32.mrf.mxu1 }
 0x30f   :  { %v694_v60 = vmul.f32 %v1233_v54, %v1233_v54  ;;  %v682_v3 = vsel %vm396_vm7, %v1233_v54, 0.0 }
 0x310   :  { %v664_v55 = vpop.f32.mrf.mxu1 }
 0x311   :  { %v692_v58 = vmul.f32 %v664_v55, %v664_v55  ;;  %v679_v62 = vsel %vm396_vm7, %v664_v55, 0.0  ;;  %v699_v8 = vsel %vm396_vm7, %v694_v60, 0.0 }
 0x312   :  { %v1234_v57 = vpop.f32.mrf.mxu1 }
 0x313   :  { %v696_v2 = vsel %vm396_vm7, %v692_v58, 0.0  ;;  %v695_v4 = vmul.f32 %v1234_v57, %v1234_v57  ;;  %v684_v39 = vsel %vm396_vm7, %v1234_v57, 0.0  ;;  %v757_v58 = vpop.permute.xlu0 %756 }
 0x314   :  { %v667_v59 = vpop.f32.mrf.mxu1 }
 0x315   :  { %v680_v63 = vsel %vm396_vm7, %v667_v59, 0.0  ;;  %v693_v0 = vmul.f32 %v667_v59, %v667_v59  ;;  %v701_v10 = vsel %vm396_vm7, %v695_v4, 0.0 }
 0x316   :  { %v681_v1 = vadd.f32 %v680_v63, %v679_v62 }
 0x317   :  { %v697_v5 = vsel %vm396_vm7, %v693_v0, 0.0 }
 0x318   :  { %v683_v7 = vadd.f32 %v682_v3, %v681_v1  ;;  %v698_v37 = vadd.f32 %v697_v5, %v696_v2  ;;  %v913_v3 = vld [vmem:[%s1817_s16] sm:$0xff] }
 0x31a   :  { %v685_v9 = vadd.f32 %v684_v39, %v683_v7  ;;  %v700_v38 = vadd.f32 %v699_v8, %v698_v37 }
 0x31c   :  { %v686_v40 = vrot.slane %v685_v9, 4  ;;  %v702_v11 = vadd.f32 %v701_v10, %v700_v38 }
 0x31e   :  { %v687_v52 = vadd.f32 %v686_v40, %v685_v9  ;;  %v703_v56 = vrot.slane %v702_v11, 4  ;;  %v1280_v9 = vld [vmem:[%s1814_s13 + $0x10] sm:$0xff]  }
 0x31f   :  { %1244 = vmatpush3.bf16.msra.mxu0 %v1280_v9 }
 0x320   :  { %v688_v61 = vrot.slane %v687_v52, 2  ;;  %v704_v12 = vadd.f32 %v703_v56, %v702_v11  ;;  %1245 = vmatprep.subr.bf16.mxu0 %v1317_v6 }
 0x322   :  { %v689_v13 = vadd.f32 %v688_v61, %v687_v52  ;;  %v705_v14 = vrot.slane %v704_v12, 2 }
 0x323   :  { %1246 = vmatpush3.bf16.msra.mxu0 %v1281_v51 }
 0x324   :  { %v690_v15 = vrot.slane %v689_v13, 1  ;;  %v706_v16 = vadd.f32 %v705_v14, %v704_v12  ;;  %1247 = vmatprep.subr.bf16.mxu0 %v1317_v6 }
 0x326   :  { %v691_v17 = vadd.f32 %v690_v15, %v689_v13  ;;  %v707_v18 = vrot.slane %v706_v16, 1 }
 0x328   :  { %v708_v19 = vadd.f32 %v707_v18, %v706_v16  ;;  %v709_v20 = vmul.f32 0.03125, %v691_v17 }
 0x32a   :  { %v710_v21 = vmul.f32 0.03125, %v708_v19  ;;  %v711_v22 = vmul.f32 %v709_v20, %v709_v20 }
 0x32c   :  { %v712_v23 = vsub.f32 %v710_v21, %v711_v22 }
 0x32e   :  { %v714_v24 = vadd.f32 1e-05, %v712_v23 }
 0x330   :  { %1288 = vrsqrt.f32 %v714_v24 }
 0x33d   :  { %v1289_v26 = vpop.eup %1288 }
 0x33e   :  { %v716_v27 = vmul.f32 %v1289_v26, %v713_v25 }
 0x340   :  { %v718_v29 = vmul.f32 %v716_v27, %v709_v20  ;;  %v724_v30 = vrot.slane %v716_v27, %v1629_v44 }
 0x342   :  { %v719_v31 = vsub.f32 %v717_v28, %v718_v29  ;;  %v726_v32 = vmul.f32 %v724_v30, %v664_v55  ;;  %v727_v33 = vmul.f32 %v724_v30, %v667_v59  ;;  %v728_v34 = vmul.f32 %v1233_v54, %v724_v30 }
 0x343   :  { %v729_v35 = vmul.f32 %v1234_v57, %v724_v30  ;;  %v762_v57 = vpop.permute.xlu1 %761 }
 0x344   :  { %v734_v36 = vrot.slane %v719_v31, %v1629_v44 }
 0x346   :  { %v736_v41 = vadd.f32 %v734_v36, %v726_v32  ;;  %v737_v42 = vadd.f32 %v734_v36, %v727_v33  ;;  %v738_v43 = vadd.f32 %v734_v36, %v728_v34  ;;  %v739_v45 = vadd.f32 %v734_v36, %v729_v35  ;;  %v883_v34 = vld [vmem:[%s1811_s10] sm:$0x1] }
 0x348   :  { %v740_v46 = vmax.f32 %v736_v41, 0.0  ;;  %v741_v47 = vmax.f32 %v737_v42, 0.0  ;;  %v742_v48 = vmax.f32 %v738_v43, 0.0  ;;  %v743_v49 = vmax.f32 %v739_v45, 0.0  ;;  %v887_v41 = vld [vmem:[%s1812_s11] sm:$0x1] }
 0x349   :  { %s1322_s11 = smov 32  }
 0x34a   :  { %745 = vst.msk [vmem:[#allocation4 + $0x1] sm:$0xff] %vm396_vm7, %v740_v46  ;;  %746 = vst.msk [vmem:[#allocation4 + $0x9] sm:$0xff] %vm396_vm7, %v741_v47 }
 0x34b   :  { %747 = vst.msk [vmem:[#allocation4 + $0x11] sm:$0xff] %vm396_vm7, %v742_v48  ;;  %748 = vst.msk [vmem:[#allocation4 + $0x19] sm:$0xff] %vm396_vm7, %v743_v49 }
 0x351   :  { %v767_v55 = vld [vmem:[#allocation4 + $0x1] ss:$2 sm:$0xff]  ;;  %v749_v60 = vld [vmem:[#allocation4] ss:$2 sm:$0xff] }
 0x352   :  { %v769_v54 = vld [vmem:[#allocation4 + $0x11] ss:$2 sm:$0xff]  ;;  %778 = vrot.lane.b32.xlu0 %v767_v55, %s1319_s29  ;;  %v751_v59 = vld [vmem:[#allocation4 + $0x10] ss:$2 sm:$0xff]  ;;  %v764_v63 = vmul.f32 %v757_v58, %v749_v60 }
 0x353   :  { %780 = vrot.lane.b32.xlu1 %v769_v54, %s1319_s29  ;;  %v765_v62 = vmul.f32 %v762_v57, %v751_v59  ;;  %v773_v0 = vld [vmem:[#allocation4 + $0x12] ss:$2 sm:$0xff]  ;;  %v771_v1 = vld [vmem:[#allocation4 + $0x2] ss:$2 sm:$0xff] }
 0x354   :  { %774 = vst.msk [vmem:[#allocation9] sm:$0xff] %vm396_vm7, %v764_v63  ;;  %v1282_v55 = vld [vmem:[%s1814_s13] sm:$0xff]  }
 0x355   :  { %775 = vst.msk [vmem:[#allocation9 + $0x8] sm:$0xff] %vm396_vm7, %v765_v62  ;;  %1248 = vmatpush3.bf16.msra.mxu0 %v1282_v55  ;;  %v1051_v63 = vld [vmem:[%s1820_s19] sm:$0xf] }
 0x356   :  { %788 = vrot.lane.b32.xlu0 %v771_v1, %s1320_s5 }
 0x357   :  { %790 = vrot.lane.b32.xlu1 %v773_v0, %s1320_s5 }
 0x35a   :  { %916 = vperm.xlu0 %1273, %v913_v3  }
 0x3c4   :  { %v779_v4 = vpop.permute.xlu0 %778 }
 0x3c5   :  { %v781_v2 = vpop.permute.xlu1 %780  ;;  %784 = vst.msk [vmem:[#allocation9] sm:$0xff] %vm575_vm9, %v779_v4 }
 0x3c6   :  { %785 = vst.msk [vmem:[#allocation9 + $0x8] sm:$0xff] %vm575_vm9, %v781_v2 }
 0x3c8   :  { %v789_v7 = vpop.permute.xlu0 %788 }
 0x3c9   :  { %v791_v5 = vpop.permute.xlu1 %790  ;;  %794 = vst.msk [vmem:[#allocation9] sm:$0xff] %vm596_vm10, %v789_v7 }
 0x3ca   :  { %795 = vst.msk [vmem:[#allocation9 + $0x8] sm:$0xff] %vm596_vm10, %v791_v5 }
 0x3d0   :  { %v796_v37 = vld [vmem:[#allocation9] sm:$0xff] }
 0x3d1   :  { %v797_v8 = vld [vmem:[#allocation9 + $0x8] sm:$0xff] }
 0x3d2   :  { %v798_v39 = vpack.c.bf16 %v797_v8, %v796_v37 }
 0x3d4   :  { %1240 = vmatmul.mubr.msk.bf16.vlgmr.msra.gmra.mxu1 %vm619_vm11, %v798_v39 }
 0x3d5   :  { %1259 = vmatprep.mubr.msk.bf16.mxu1 %vm1321_vm12, %v1317_v6  ;;  %v917_v57 = vpop.permute.xlu0 %916 }
 0x494   :  { %v851_v38 = vpop.f32.mrf.mxu1 }
 0x495   :  { %v868_v40 = vmul.f32 %v851_v38, %v851_v38  ;;  %v859_v52 = vsel %vm858_vm14, %v851_v38, 0.0 }
 0x496   :  { %v1241_v10 = vpop.f32.mrf.mxu1 }
 0x497   :  { %v870_v14 = vsel %vm858_vm14, %v868_v40, 0.0 }
 0x498   :  { %v854_v11 = vpop.f32.mrf.mxu1 }
 0x499   :  { %v860_v56 = vsel %vm858_vm14, %v854_v11, 0.0  ;;  %v869_v61 = vmul.f32 %v854_v11, %v854_v11 }
 0x49a   :  { %v861_v12 = vadd.f32 %v860_v56, %v859_v52  ;;  %v1242_v13 = vpop.f32.mrf.mxu1 }
 0x49b   :  { %v871_v15 = vsel %vm858_vm14, %v869_v61, 0.0 }
 0x49c   :  { %v862_v16 = vrot.slane %v861_v12, 4  ;;  %v872_v17 = vadd.f32 %v871_v15, %v870_v14 }
 0x49e   :  { %v863_v18 = vadd.f32 %v862_v16, %v861_v12  ;;  %v873_v19 = vrot.slane %v872_v17, 4 }
 0x4a0   :  { %v864_v20 = vrot.slane %v863_v18, 2  ;;  %v874_v21 = vadd.f32 %v873_v19, %v872_v17 }
 0x4a2   :  { %v865_v22 = vadd.f32 %v864_v20, %v863_v18  ;;  %v875_v23 = vrot.slane %v874_v21, 2 }
 0x4a4   :  { %v866_v24 = vrot.slane %v865_v22, 1  ;;  %v876_v25 = vadd.f32 %v875_v23, %v874_v21 }
 0x4a6   :  { %v867_v26 = vadd.f32 %v866_v24, %v865_v22  ;;  %v877_v27 = vrot.slane %v876_v25, 1  ;;  %v1026_v22 = vld [vmem:[%s1815_s14] sm:$0x1] }
 0x4a8   :  { %v878_v28 = vadd.f32 %v877_v27, %v876_v25  ;;  %v879_v29 = vmul.f32 0.0625, %v867_v26  ;;  %v1030_v25 = vld [vmem:[%s1816_s15] sm:$0x1] }
 0x4aa   :  { %v880_v30 = vmul.f32 0.0625, %v878_v28  ;;  %v881_v31 = vmul.f32 %v879_v29, %v879_v29 }
 0x4ac   :  { %v882_v32 = vsub.f32 %v880_v30, %v881_v31 }
 0x4ae   :  { %v884_v33 = vadd.f32 1e-05, %v882_v32  ;;  %v1283_v32 = vld [vmem:[%s1818_s17 + $0x10] sm:$0xff]  }
 0x4af   :  { %1254 = vmatpush3.bf16.msra.mxu1 %v1283_v32 }
 0x4b0   :  { %1290 = vrsqrt.f32 %v884_v33  ;;  %1255 = vmatprep.subr.bf16.mxu1 %v1317_v6 }
 0x4bd   :  { %v1291_v35 = vpop.eup %1290 }
 0x4be   :  { %v886_v36 = vmul.f32 %v1291_v35, %v883_v34  ;;  %v1284_v34 = vld [vmem:[%s1818_s17 + $0x8] sm:$0xff]  }
 0x4bf   :  { %1256 = vmatpush3.bf16.msra.mxu1 %v1284_v34 }
 0x4c0   :  { %v888_v42 = vmul.f32 %v886_v36, %v879_v29  ;;  %v894_v43 = vrot.slane %v886_v36, %v1629_v44  ;;  %1257 = vmatprep.subr.bf16.mxu1 %v1317_v6 }
 0x4c2   :  { %v889_v45 = vsub.f32 %v887_v41, %v888_v42  ;;  %v896_v46 = vmul.f32 %v894_v43, %v851_v38  ;;  %v897_v47 = vmul.f32 %v894_v43, %v854_v11 }
 0x4c4   :  { %v902_v48 = vrot.slane %v889_v45, %v1629_v44 }
 0x4c6   :  { %v904_v49 = vadd.f32 %v902_v48, %v896_v46  ;;  %v905_v50 = vadd.f32 %v902_v48, %v897_v47 }
 0x4c8   :  { %v906_v53 = vmax.f32 %v904_v49, 0.0  ;;  %v907_v54 = vmax.f32 %v905_v50, 0.0 }
 0x4ca   :  { %910 = vst.msk [vmem:[#allocation5 + $0x1] sm:$0xff] %vm858_vm14, %v906_v53  ;;  %911 = vst.msk [vmem:[#allocation5 + $0x9] sm:$0xff] %vm858_vm14, %v907_v54 }
 0x4d1   :  { %v923_v58 = vld [vmem:[#allocation5 + $0x2] ss:$2 sm:$0xff]  ;;  %v921_v59 = vld [vmem:[#allocation5 + $0x1] ss:$2 sm:$0xff] }
 0x4d2   :  { %v912_v60 = vld [vmem:[#allocation5] ss:$2 sm:$0xff]  ;;  %932 = vrot.lane.b32.xlu0 %v923_v58, %s1322_s11  ;;  %926 = vrot.lane.b32.xlu1 %v921_v59, %s1320_s5 }
 0x4d3   :  { %v919_v62 = vmul.f32 %v917_v57, %v912_v60  ;;  %v1196_v57 = vld [vmem:[%s1819_s18] ss:$0 sm:$0xff] }
 0x4d5   :  { %924 = vst.msk [vmem:[#allocation10] sm:$0xff] %vm858_vm14, %v919_v62 }
 0x4d6   :  { %1054 = vperm.xlu1 %1274, %v1051_v63  }
 0x544   :  { %v933_v0 = vpop.permute.xlu0 %932  ;;  %v927_v1 = vpop.permute.xlu1 %926 }
 0x545   :  { %930 = vst.msk [vmem:[#allocation10] sm:$0xff] %vm929_vm15, %v927_v1 }
 0x546   :  { %936 = vst.msk [vmem:[#allocation10] sm:$0xff] %vm935_vm0, %v933_v0 }
 0x54d   :  { %v937_v3 = vld [vmem:[#allocation10] sm:$0xff] }
 0x54e   :  { %v938_v2 = vpack.c.bf16 %v937_v3, %v937_v3 }
 0x550   :  { %1250 = vmatmul.mubr.msk.bf16.vlgmr.msra.gmra.mxu0 %vm963_vm1, %v938_v2 }
 0x551   :  { %v1055_v41 = vpop.permute.xlu1 %1054 }
 0x610   :  { %v1001_v4 = vpop.f32.mrf.mxu0 }
 0x611   :  { %v1007_v5 = vsel %vm858_vm14, %v1001_v4, 0.0  ;;  %v1014_v7 = vmul.f32 %v1001_v4, %v1001_v4 }
 0x612   :  { %v1008_v37 = vrot.slane %v1007_v5, 4  ;;  %v1251_v8 = vpop.f32.mrf.mxu0 }
 0x613   :  { %v1015_v39 = vsel %vm858_vm14, %v1014_v7, 0.0 }
 0x614   :  { %v1009_v9 = vadd.f32 %v1008_v37, %v1007_v5  ;;  %v1016_v38 = vrot.slane %v1015_v39, 4  ;;  %v1004_v10 = vpop.f32.mrf.mxu0 }
 0x616   :  { %v1010_v40 = vrot.slane %v1009_v9, 2  ;;  %v1017_v11 = vadd.f32 %v1016_v38, %v1015_v39  ;;  %v1252_v52 = vpop.f32.mrf.mxu0 }
 0x618   :  { %v1011_v56 = vadd.f32 %v1010_v40, %v1009_v9  ;;  %v1018_v61 = vrot.slane %v1017_v11, 2 }
 0x61a   :  { %v1012_v12 = vrot.slane %v1011_v56, 1  ;;  %v1019_v13 = vadd.f32 %v1018_v61, %v1017_v11 }
 0x61c   :  { %v1013_v14 = vadd.f32 %v1012_v12, %v1011_v56  ;;  %v1020_v15 = vrot.slane %v1019_v13, 1 }
 0x61e   :  { %v1021_v16 = vadd.f32 %v1020_v15, %v1019_v13  ;;  %v1022_v17 = vmul.f32 0.125, %v1013_v14 }
 0x620   :  { %v1023_v18 = vmul.f32 0.125, %v1021_v16  ;;  %v1024_v19 = vmul.f32 %v1022_v17, %v1022_v17 }
 0x622   :  { %v1025_v20 = vsub.f32 %v1023_v18, %v1024_v19 }
 0x624   :  { %v1027_v21 = vadd.f32 1e-05, %v1025_v20 }
 0x626   :  { %1292 = vrsqrt.f32 %v1027_v21 }
 0x633   :  { %v1293_v23 = vpop.eup %1292 }
 0x634   :  { %v1029_v24 = vmul.f32 %v1293_v23, %v1026_v22 }
 0x636   :  { %v1031_v26 = vmul.f32 %v1029_v24, %v1022_v17  ;;  %v1037_v27 = vrot.slane %v1029_v24, %v1629_v44 }
 0x638   :  { %v1032_v28 = vsub.f32 %v1030_v25, %v1031_v26  ;;  %v1039_v29 = vmul.f32 %v1037_v27, %v1001_v4 }
 0x63a   :  { %v1044_v30 = vrot.slane %v1032_v28, %v1629_v44  ;;  %v1285_v44 = vld [vmem:[%s1818_s17] sm:$0xff]  }
 0x63b   :  { %1258 = vmatpush3.bf16.msra.mxu1 %v1285_v44 }
 0x63c   :  { %v1046_v31 = vadd.f32 %v1044_v30, %v1039_v29 }
 0x63e   :  { %v1047_v33 = vmax.f32 %v1046_v31, 0.0 }
 0x640   :  { %1049 = vst.msk [vmem:[#allocation6 + $0x1] sm:$0xff] %vm858_vm14, %v1047_v33 }
 0x647   :  { %v1061_v35 = vld [vmem:[#allocation6 + $0x2] ss:$2 sm:$0xf]  ;;  %v1059_v36 = vld [vmem:[#allocation6 + $0x1] ss:$2 sm:$0xf] }
 0x648   :  { %1071 = vrot.lane.b32.xlu1 %v1061_v35, %s1322_s11  ;;  %1065 = vrot.lane.b32.xlu0 %v1059_v36, %s1320_s5  ;;  %v1050_v42 = vld [vmem:[#allocation6] ss:$2 sm:$0xf] }
 0x649   :  { %v1057_v43 = vmul.f32 %v1055_v41, %v1050_v42 }
 0x64b   :  { %1063 = vst.msk [vmem:[#allocation11] sm:$0xf] %vm1062_vm2, %v1057_v43 }
 0x6ba   :  { %v1072_v45 = vpop.permute.xlu1 %1071  ;;  %v1066_v46 = vpop.permute.xlu0 %1065 }
 0x6bb   :  { %1069 = vst.msk [vmem:[#allocation11] sm:$0xf] %vm1068_vm3, %v1066_v46 }
 0x6bc   :  { %1075 = vst.msk [vmem:[#allocation11] sm:$0xf] %vm1074_vm4, %v1072_v45 }
 0x6c3   :  { %v1076_v47 = vld [vmem:[#allocation11] sm:$0xf] }
 0x6c4   :  { %v1077_v6 = vpack.c.bf16 %v1076_v47, %v1076_v47 }
 0x6c6   :  { %1260 = vmatmul.mubr.msk.bf16.vlgmr.msra.gmra.mxu1 %vm963_vm1, %v1077_v6 }
 0x786   :  { %v1139_v48 = vpop.f32.mrf.mxu1 }
 0x787   :  { %1146 = vst.msk [vmem:[#allocation12] sm:$0xf] %vm1145_vm5, %v1139_v48 }
 0x788   :  { %v1261_v49 = vpop.f32.mrf.mxu1 }
 0x78a   :  { %v1142_v50 = vpop.f32.mrf.mxu1 }
 0x78c   :  { %v1262_v51 = vpop.f32.mrf.mxu1 }
 0x78e   :  { %v1147_v53 = vld [vmem:[#allocation12] ss:$2 sm:$0x3]  ;;  %v1149_v54 = vld [vmem:[#allocation12 + $0x1] ss:$2 sm:$0x3] }
 0x78f   :  { %v1150_v55 = vadd.f32 %v1149_v54, %v1147_v53 }
 0x791   :  { %v1151_v58 = vmul.f32 0.5, %v1150_v55 }
 0x793   :  { %v1159_v59 = vadd.f32 %v1196_v57, %v1151_v58 }
 0x795   :  { %1161 = vst.msk [vmem:[#allocation13] sm:$0x3] %vm1160_vm6, %v1159_v59 }
 0x796   :  { %1305 = shalt.err (!%p1302_p4)
}
 0x797   :  { %1171 = dma.vmem_to_hbm [thread:$0]  %s1169_s4, 32, %s1821_s20, [#allocation14]  }
 0x798   :  { %1314 = dma.done.wait [#allocation14], 32  }
 0x799   :  { %1315 = vsyncadd [#allocation14], 4294967264 }
 0x79a   :  { %1175 = vsyncpa [#allocation14], 1 }

</bundles_post_ra>
